<compile_context>
chip_gen: v6e
topology: v6e:2x2x1
jax: 0.10.0
libtpu: 0.0.40
codegen_flags: <defaults>
</compile_context>

<pallas_src>
import jax
import jax.numpy as jnp
from jax import lax
from jax.experimental import pallas as pl
from jax.experimental.pallas import tpu as pltpu


def _round_up(x, m):
    return (x + m - 1) // m * m


# ----------------------------------------------------------------------------- kernel
def _make_fused_kernel(layer_cfgs, T, Wd, Hd, peephole):
    """Fused multi-layer, full-sequence Conv-LSTM kernel (one invocation = one
    batch element, all T time steps, all stacked layers)."""
    HW = Wd * Hd
    W = Hd                       # fast (lane) spatial axis length
    n_layers = len(layer_cfgs)
    inv_hw = 1.0 / HW

    def kernel(*refs):
        idx = 0
        x_ref = refs[idx]; idx += 1                       # (T, Cin_p, HW) f32
        w_refs, b_refs, g_refs, bt_refs = [], [], [], []
        for cfg in layer_cfgs:
            w_refs.append(refs[idx]); idx += 1            # (Cout_p, 9*Cin_full_p) bf16
            b_refs.append(refs[idx]); idx += 1            # (Cout_p, 1) f32
            if cfg["norm"]:
                g_refs.append(refs[idx]); idx += 1        # (Ct_p, 1) f32
                bt_refs.append(refs[idx]); idx += 1       # (Ct_p, 1) f32
            else:
                g_refs.append(None)
                bt_refs.append(None)
        h_out_ref = refs[idx]; idx += 1                   # (Chp_last, HW) f32

        # ---- hoisted per-invocation constants (shared by every time step) ----
        # Reflect-boundary masks over the flattened (y*W + x) lane axis.
        pos = lax.broadcasted_iota(jnp.int32, (1, HW), 1)
        xcol = pos % W
        m_x_lo = xcol == 0
        m_x_hi = xcol == (W - 1)
        m_y_lo = pos < W
        m_y_hi = pos >= (HW - W)

        # Loop-invariant parameters: load once, close over them in the time loop.
        w_vals = [w_refs[i][...] for i in range(n_layers)]
        b_vals = [b_refs[i][...] for i in range(n_layers)]
        g_vals = [g_refs[i][...] if layer_cfgs[i]["norm"] else None
                  for i in range(n_layers)]
        bt_vals = [bt_refs[i][...] if layer_cfgs[i]["norm"] else None
                   for i in range(n_layers)]

        def im2col(a):
            """(Cin_full_p, HW) -> (9*Cin_full_p, HW): reflect-padded 3x3 patches,
            tap order (ky, kx) row-major, matching the merged weight layout.
            All concat pieces have a multiple-of-8 row count -> aligned copies."""
            a_yp = pltpu.roll(a, HW - W, axis=1)          # a[y+1, x]
            a_ym = pltpu.roll(a, W, axis=1)               # a[y-1, x]
            ys = (
                jnp.where(m_y_lo, a_yp, a_ym),            # dy = -1 (reflect 0 -> 1)
                a,                                        # dy =  0
                jnp.where(m_y_hi, a_ym, a_yp),            # dy = +1 (reflect end)
            )
            rows = []
            for ay in ys:
                a_xp = pltpu.roll(ay, HW - 1, axis=1)     # ay[y, x+1]
                a_xm = pltpu.roll(ay, 1, axis=1)          # ay[y, x-1]
                rows.append(jnp.where(m_x_lo, a_xp, a_xm))   # dx = -1
                rows.append(ay)                              # dx =  0
                rows.append(jnp.where(m_x_hi, a_xm, a_xp))   # dx = +1
            return jnp.concatenate(rows, axis=0)

        def cell(i, inp, h, c):
            cfg = layer_cfgs[i]
            Ch, Cc, Chp, Ccp = cfg["Ch"], cfg["Cc"], cfg["Chp"], cfg["Ccp"]
            comb = jnp.concatenate([inp, h], axis=0)      # (Ct_p, HW), 8-aligned
            if cfg["norm"]:
                # InstanceNorm2d (affine, biased var, eps=1e-5), single reduction
                # pass: var = E[x^2] - mean^2; fused scale/shift.
                mean = jnp.sum(comb, axis=1, keepdims=True) * inv_hw
                meansq = jnp.sum(comb * comb, axis=1, keepdims=True) * inv_hw
                var = meansq - mean * mean
                scale = lax.rsqrt(var + 1e-5) * g_vals[i]   # padded rows: gamma=0
                comb = comb * scale + (bt_vals[i] - mean * scale)
            full = jnp.concatenate([comb, c], axis=0) if peephole else comb
            patch = im2col(full).astype(jnp.bfloat16)     # (9*Cin_full_p, HW)
            # conv_cc (+ merged peephole conv_ll) as ONE bf16 MXU matmul, f32 acc.
            acc = jnp.dot(w_vals[i], patch,
                          preferred_element_type=jnp.float32) + b_vals[i]
            # Gate rows padded to multiples of 8 -> all slices sublane-aligned.
            i_g = jax.nn.sigmoid(acc[0:Ccp])
            f_g = jax.nn.sigmoid(acc[Ccp:2 * Ccp])
            g_g = jnp.tanh(acc[2 * Ccp:3 * Ccp])
            o_g = jax.nn.sigmoid(acc[3 * Ccp:3 * Ccp + Chp])
            c_next = f_g * c + i_g * g_g                  # (Ccp, HW)
            if Cc == Ch:
                tanh_c = jnp.tanh(c_next)
            else:                                         # Cc == 1 (big_mem=False)
                tanh_c = jnp.tanh(c_next[0:1])            # == .repeat over Ch rows
            h_next = o_g * tanh_c                         # (Chp, HW)
            return h_next, c_next

        def step(t, carry):
            hs, cs = carry
            inp = x_ref[t]                                # (Cin_p, HW) f32
            new_hs, new_cs = [], []
            for i in range(n_layers):
                h_next, c_next = cell(i, inp, hs[i], cs[i])
                new_hs.append(h_next)
                new_cs.append(c_next)
                inp = h_next
            return tuple(new_hs), tuple(new_cs)

        hs0 = tuple(jnp.zeros((cfg["Chp"], HW), jnp.float32) for cfg in layer_cfgs)
        cs0 = tuple(jnp.zeros((cfg["Ccp"], HW), jnp.float32) for cfg in layer_cfgs)
        hs, _ = lax.fori_loop(0, T, step, (hs0, cs0))
        h_out_ref[...] = hs[-1].astype(h_out_ref.dtype)

    return kernel


# ----------------------------------------------------------------------------- params
def init_conv_lstm_params(key, input_dim, h_channels, big_mem, kernel_size,
                          memory_kernel_size, layer_norm_flag, peephole):
    """Deterministic synthetic parameters matching Conv_LSTM.__init__ shapes,
    stored in PyTorch layout (conv weights OIHW)."""
    params = []
    for i, Ch in enumerate(h_channels):
        Cc = Ch if big_mem else 1
        cin = input_dim if i == 0 else h_channels[i - 1]
        Ct = cin + Ch
        key, k1, k2, k3, k4, k5 = jax.random.split(key, 6)
        p = {
            "w_cc": 0.1 * jax.random.normal(
                k1, (Ch + 3 * Cc, Ct, kernel_size, kernel_size), jnp.float32),
            "b_cc": 0.1 * jax.random.normal(k2, (Ch + 3 * Cc,), jnp.float32),
        }
        if peephole:
            p["w_ll"] = 0.1 * jax.random.normal(
                k3, (Ch + 2 * Cc, Cc, memory_kernel_size, memory_kernel_size),
                jnp.float32)
        if layer_norm_flag and i != 0:
            p["gamma"] = 1.0 + 0.05 * jax.random.normal(k4, (Ct,), jnp.float32)
            p["beta"] = 0.05 * jax.random.normal(k5, (Ct,), jnp.float32)
        params.append(p)
    return params


def _prepare_layer_params(p, cin, Ch, Cc, peephole, has_norm):
    """Convert PyTorch-layout conv parameters into the padded, merged,
    channel-first im2col weight used by the kernel.

    All channel counts are zero-padded to multiples of 8 so that every in-kernel
    concatenate and gate slice is sublane-aligned:
      * input-channel layout per tap: [inp 0..cin_p | h 0..Chp | c 0..Ccp(peephole)]
      * output-row layout:            [i 0..Ccp | f Ccp..2Ccp | g 2Ccp..3Ccp | o 3Ccp..3Ccp+Chp]
    The conv_ll (peephole) columns are merged in (zero for the g gate).  The
    merged weight is pre-cast to bf16 (the matmul keeps f32 accumulation)."""
    cin_p = _round_up(cin, 8)
    Chp = _round_up(Ch, 8)
    Ccp = _round_up(Cc, 8)
    Ct_p = cin_p + Chp
    Cin_full_p = Ct_p + (Ccp if peephole else 0)
    Cout_p = 3 * Ccp + Chp

    w_cc = jnp.transpose(p["w_cc"], (0, 2, 3, 1))     # (Ch+3Cc, 3, 3, cin+Ch)
    wb = jnp.zeros((Cout_p, 3, 3, Cin_full_p), jnp.float32)

    gate_src = [(0, Cc), (Cc, Cc), (2 * Cc, Cc), (3 * Cc, Ch)]   # i, f, g, o
    gate_dst = [0, Ccp, 2 * Ccp, 3 * Ccp]
    for (s0, n), d0 in zip(gate_src, gate_dst):
        blk = w_cc[s0:s0 + n]
        wb = wb.at[d0:d0 + n, :, :, 0:cin].set(blk[:, :, :, 0:cin])
        wb = wb.at[d0:d0 + n, :, :, cin_p:cin_p + Ch].set(blk[:, :, :, cin:cin + Ch])

    if peephole:
        w_ll = jnp.transpose(p["w_ll"], (0, 2, 3, 1))  # (Ch+2Cc, 3, 3, Cc): [i, f, o]
        ll_src = [(0, Cc), (Cc, Cc), (2 * Cc, Ch)]
        ll_dst = [0, Ccp, 3 * Ccp]
        for (s0, n), d0 in zip(ll_src, ll_dst):
            wb = wb.at[d0:d0 + n, :, :, Ct_p:Ct_p + Cc].set(w_ll[s0:s0 + n])

    b = jnp.zeros((Cout_p, 1), jnp.float32)
    for (s0, n), d0 in zip(gate_src, gate_dst):
        b = b.at[d0:d0 + n, 0].set(p["b_cc"][s0:s0 + n])

    out = {
        "w": wb.reshape(Cout_p, 9 * Cin_full_p).astype(jnp.bfloat16),
        "b": b,
    }
    if has_norm:
        gamma = jnp.zeros((Ct_p, 1), jnp.float32)      # padded rows -> gamma=0, beta=0
        beta = jnp.zeros((Ct_p, 1), jnp.float32)
        gamma = gamma.at[0:cin, 0].set(p["gamma"][0:cin])
        gamma = gamma.at[cin_p:cin_p + Ch, 0].set(p["gamma"][cin:cin + Ch])
        beta = beta.at[0:cin, 0].set(p["beta"][0:cin])
        beta = beta.at[cin_p:cin_p + Ch, 0].set(p["beta"][cin:cin + Ch])
        out["gamma"] = gamma
        out["beta"] = beta
    pads = {"cin_p": cin_p, "Chp": Chp, "Ccp": Ccp,
            "Cin_full_p": Cin_full_p, "Cout_p": Cout_p}
    return out, pads


# ----------------------------------------------------------------------------- model
def conv_lstm_forward(x, params, h_channels, *, big_mem=True, peephole=True,
                      layer_norm_flag=True, prediction_count=1):
    """Conv_LSTM.forward with baseline='last_frame'.

    x: (b, c, w, h, t) like the PyTorch module. Returns (preds, pred_deltas,
    baselines), each (b, output_dim, w, h, prediction_count)."""
    assert prediction_count == 1
    # TODO(synk): prediction_count > 1 autoregressive rollout with non_pred_feat
    #             feedback (and 'mean_cube'/'zeros' baselines) is not implemented.
    B, C, Wd, Hd, T = x.shape
    HW = Wd * Hd
    n_layers = len(params)

    layer_cfgs, kparams = [], []
    for i in range(n_layers):
        Ch = h_channels[i]
        Cc = Ch if big_mem else 1
        cin = C if i == 0 else h_channels[i - 1]
        has_norm = bool(layer_norm_flag and i != 0)
        # TODO(synk): only kernel_size == memory_kernel_size == 3 with
        #             dilation_rate == 1 (reflect 'same' pad of 1) is supported.
        assert params[i]["w_cc"].shape[2] == 3 and params[i]["w_cc"].shape[3] == 3
        if peephole:
            assert params[i]["w_ll"].shape[2] == 3 and params[i]["w_ll"].shape[3] == 3
        kp, pads = _prepare_layer_params(params[i], cin, Ch, Cc, peephole, has_norm)
        cfg = {"Ch": Ch, "Cc": Cc, "norm": has_norm}
        cfg.update(pads)
        layer_cfgs.append(cfg)
        kparams.append(kp)

    Cin_p = layer_cfgs[0]["cin_p"]
    Chp_last = layer_cfgs[-1]["Chp"]
    Ch_last = h_channels[-1]

    # Single layout transform + channel pad for the whole sequence (hoisted out
    # of any loop): (b, c, w, h, t) -> (b, t, c_pad, w*h).
    x_seq = jnp.transpose(x, (0, 4, 1, 2, 3)).reshape(B, T, C, HW)
    x_seq = jnp.pad(x_seq, ((0, 0), (0, 0), (0, Cin_p - C), (0, 0)))

    # x: one DMA of the full T-sequence per batch element; the time recurrence
    # runs entirely inside the kernel so the grid is only (B,).
    args = [x_seq]
    in_specs = [pl.BlockSpec((None, T, Cin_p, HW), lambda b: (b, 0, 0, 0))]
    # Invariant per-layer parameters: unblocked whole-array VMEM inputs (no
    # pipelining / double buffering).
    vmem_spec = pl.BlockSpec(memory_space=pltpu.MemorySpace.VMEM)
    for i in range(n_layers):
        kp = kparams[i]
        args.append(kp["w"]); in_specs.append(vmem_spec)
        args.append(kp["b"]); in_specs.append(vmem_spec)
        if layer_cfgs[i]["norm"]:
            args.append(kp["gamma"]); in_specs.append(vmem_spec)
            args.append(kp["beta"]); in_specs.append(vmem_spec)

    kernel = _make_fused_kernel(layer_cfgs, T, Wd, Hd, peephole)

    # Each grid step handles one batch element end-to-end (state is a fori-loop
    # carry), so the B axis is truly independent -> "parallel" is safe and lets
    # v7x's two TensorCores each take one batch element.
    h_last = pl.pallas_call(
        kernel,
        grid=(B,),
        in_specs=in_specs,
        out_specs=pl.BlockSpec((None, Chp_last, HW), lambda b: (b, 0, 0)),
        out_shape=jax.ShapeDtypeStruct((B, Chp_last, HW), jnp.float32),
        compiler_params=pltpu.CompilerParams(
            dimension_semantics=("parallel",)),
    )(*args)

    pred_delta = h_last[:, :Ch_last].reshape(B, Ch_last, Wd, Hd)       # NCHW
    # baseline='last_frame': last time-frame of the first min(5, C) channels.
    n_base = min(5, C)
    assert n_base == Ch_last, "baseline channels must match output_dim"
    baseline = x[:, 0:n_base, :, :, -1]
    preds = pred_delta + baseline
    return preds[..., None], pred_delta[..., None], baseline[..., None]


# ----------------------------------------------------------------------------- main
if __name__ == "__main__":
    key = jax.random.PRNGKey(0)

    # Module config: input_dim=4, output_dim=4, hidden_dims=8, num_layers=2,
    # big_mem=True, kernel_size=3, memory_kernel_size=3, dilation_rate=1,
    # layer_norm_flag=True, peephole=True, baseline='last_frame'.
    input_dim, output_dim, hidden_dim = 4, 4, 8
    num_layers = 2
    h_channels = [hidden_dim] * (num_layers - 1) + [output_dim]   # [8, 4]
    B, Wd, Hd, T = 2, 16, 16, 8

    k_x, k_p = jax.random.split(key)
    x = jax.random.normal(k_x, (B, input_dim, Wd, Hd, T), jnp.float32)

    params = init_conv_lstm_params(
        k_p, input_dim, h_channels, big_mem=True, kernel_size=3,
        memory_kernel_size=3, layer_norm_flag=True, peephole=True)

    preds, pred_deltas, baselines = conv_lstm_forward(
        x, params, h_channels, big_mem=True, peephole=True,
        layer_norm_flag=True, prediction_count=1)

    jax.block_until_ready((preds, pred_deltas, baselines))
    assert preds.shape == (B, output_dim, Wd, Hd, 1)
    assert pred_deltas.shape == (B, output_dim, Wd, Hd, 1)
    assert baselines.shape == (B, output_dim, Wd, Hd, 1)
    assert bool(jnp.all(jnp.isfinite(preds)))
    print("KERNEL_OK")
</pallas_src>

<mosaic_0001>
module attributes {stable_mosaic.version = 11 : i64} {
  func.func @kernel(%arg0: i32, %arg1: memref<1x8x8x256xf32, #tpu.memory_space<vmem>>, %arg2: memref<32x216xbf16, #tpu.memory_space<vmem>>, %arg3: memref<32x1xf32, #tpu.memory_space<vmem>>, %arg4: memref<32x216xbf16, #tpu.memory_space<vmem>>, %arg5: memref<32x1xf32, #tpu.memory_space<vmem>>, %arg6: memref<16x1xf32, #tpu.memory_space<vmem>>, %arg7: memref<16x1xf32, #tpu.memory_space<vmem>>, %arg8: memref<1x8x256xf32, #tpu.memory_space<vmem>>) attributes {dimension_semantics = [#tpu.dimension_semantics<parallel>], iteration_bounds = array<i64: 2>, scalar_prefetch = 0 : i64, scratch_operands = 0 : i64, tpu.core_type = #tpu.core_type<tc>, window_params = [{transform_indices = @transform_0, window_bounds = array<i64: 1, 8, 8, 256>}, {pipeline_mode = #tpu.pipeline_mode<synchronous>, transform_indices = @transform_1, window_bounds = array<i64: 32, 216>}, {pipeline_mode = #tpu.pipeline_mode<synchronous>, transform_indices = @transform_2, window_bounds = array<i64: 32, 1>}, {pipeline_mode = #tpu.pipeline_mode<synchronous>, transform_indices = @transform_3, window_bounds = array<i64: 32, 216>}, {pipeline_mode = #tpu.pipeline_mode<synchronous>, transform_indices = @transform_4, window_bounds = array<i64: 32, 1>}, {pipeline_mode = #tpu.pipeline_mode<synchronous>, transform_indices = @transform_5, window_bounds = array<i64: 16, 1>}, {pipeline_mode = #tpu.pipeline_mode<synchronous>, transform_indices = @transform_6, window_bounds = array<i64: 16, 1>}, {transform_indices = @transform_7, window_bounds = array<i64: 1, 8, 256>}]} {
    %0 = tpu.iota {dimensions = array<i32: 1>} : vector<1x256xi32>
    %c16_i32 = arith.constant 16 : i32
    %c0_i32 = arith.constant 0 : i32
    %1 = arith.cmpi eq, %c16_i32, %c0_i32 : i32
    %c1_i32 = arith.constant 1 : i32
    %2 = arith.select %1, %c1_i32, %c16_i32 : i32
    %3 = vector.broadcast %2 : i32 to vector<1x256xi32>
    %4 = arith.remsi %0, %3 : vector<1x256xi32>
    %c0_i32_0 = arith.constant 0 : i32
    %5 = vector.broadcast %c0_i32_0 : i32 to vector<1x256xi32>
    %6 = arith.cmpi ne, %4, %5 : vector<1x256xi32>
    %c0_i32_1 = arith.constant 0 : i32
    %7 = vector.broadcast %c0_i32_1 : i32 to vector<1x256xi32>
    %8 = arith.cmpi slt, %4, %7 : vector<1x256xi32>
    %c0_i32_2 = arith.constant 0 : i32
    %9 = arith.cmpi slt, %2, %c0_i32_2 : i32
    %10 = vector.broadcast %9 : i1 to vector<1x256xi1>
    %11 = vector.broadcast %10 : vector<1x256xi1> to vector<1x256xi1>
    %12 = arith.xori %8, %11 : vector<1x256xi1>
    %13 = arith.andi %12, %6 : vector<1x256xi1>
    %14 = vector.broadcast %2 : i32 to vector<1x256xi32>
    %15 = arith.addi %4, %14 : vector<1x256xi32>
    %16 = arith.select %13, %15, %4 : vector<1x256xi1>, vector<1x256xi32>
    %c0_i32_3 = arith.constant 0 : i32
    %17 = vector.broadcast %c0_i32_3 : i32 to vector<1x256xi32>
    %18 = arith.cmpi eq, %16, %17 : vector<1x256xi32>
    %c15_i32 = arith.constant 15 : i32
    %19 = vector.broadcast %c15_i32 : i32 to vector<1x256xi32>
    %20 = arith.cmpi eq, %16, %19 : vector<1x256xi32>
    %c16_i32_4 = arith.constant 16 : i32
    %21 = vector.broadcast %c16_i32_4 : i32 to vector<1x256xi32>
    %22 = arith.cmpi slt, %0, %21 : vector<1x256xi32>
    %c240_i32 = arith.constant 240 : i32
    %23 = vector.broadcast %c240_i32 : i32 to vector<1x256xi32>
    %24 = arith.cmpi sge, %0, %23 : vector<1x256xi32>
    %c0 = arith.constant 0 : index
    %c0_5 = arith.constant 0 : index
    %25 = vector.load %arg2[%c0, %c0_5] : memref<32x216xbf16, #tpu.memory_space<vmem>>, vector<32x216xbf16>
    %c0_6 = arith.constant 0 : index
    %c0_7 = arith.constant 0 : index
    %26 = vector.load %arg4[%c0_6, %c0_7] : memref<32x216xbf16, #tpu.memory_space<vmem>>, vector<32x216xbf16>
    %c0_8 = arith.constant 0 : index
    %c0_9 = arith.constant 0 : index
    %27 = vector.load %arg3[%c0_8, %c0_9] : memref<32x1xf32, #tpu.memory_space<vmem>>, vector<32x1xf32>
    %c0_10 = arith.constant 0 : index
    %c0_11 = arith.constant 0 : index
    %28 = vector.load %arg5[%c0_10, %c0_11] : memref<32x1xf32, #tpu.memory_space<vmem>>, vector<32x1xf32>
    %c0_12 = arith.constant 0 : index
    %c0_13 = arith.constant 0 : index
    %29 = vector.load %arg6[%c0_12, %c0_13] : memref<16x1xf32, #tpu.memory_space<vmem>>, vector<16x1xf32>
    %c0_14 = arith.constant 0 : index
    %c0_15 = arith.constant 0 : index
    %30 = vector.load %arg7[%c0_14, %c0_15] : memref<16x1xf32, #tpu.memory_space<vmem>>, vector<16x1xf32>
    %cst = arith.constant 0.000000e+00 : f32
    %31 = vector.broadcast %cst : f32 to vector<8x256xf32>
    %cst_16 = arith.constant 0.000000e+00 : f32
    %32 = vector.broadcast %cst_16 : f32 to vector<8x256xf32>
    %cst_17 = arith.constant 0.000000e+00 : f32
    %33 = vector.broadcast %cst_17 : f32 to vector<8x256xf32>
    %cst_18 = arith.constant 0.000000e+00 : f32
    %34 = vector.broadcast %cst_18 : f32 to vector<8x256xf32>
    %c0_i32_19 = arith.constant 0 : i32
    %c8_i32 = arith.constant 8 : i32
    %35 = arith.addi %c0_i32_19, %c8_i32 : i32
    %c1_i32_20 = arith.constant 1 : i32
    %36:4 = scf.for %arg9 = %c0_i32_19 to %35 step %c1_i32_20 iter_args(%arg10 = %31, %arg11 = %32, %arg12 = %33, %arg13 = %34) -> (vector<8x256xf32>, vector<8x256xf32>, vector<8x256xf32>, vector<8x256xf32>)  : i32 {
      %c0_25 = arith.constant 0 : index
      %40 = arith.index_cast %arg9 : i32 to index
      %c0_26 = arith.constant 0 : index
      %c0_27 = arith.constant 0 : index
      %41 = vector.load %arg1[%c0_25, %40, %c0_26, %c0_27] : memref<1x8x8x256xf32, #tpu.memory_space<vmem>>, vector<1x1x8x256xf32>
      %42 = vector.shape_cast %41 : vector<1x1x8x256xf32> to vector<8x256xf32>
      %43 = tpu.concatenate %42, %arg10 in 0 : vector<8x256xf32>, vector<8x256xf32> -> vector<16x256xf32>
      %44 = tpu.concatenate %43, %arg12 in 0 : vector<16x256xf32>, vector<8x256xf32> -> vector<24x256xf32>
      %c240_i32_28 = arith.constant 240 : i32
      %45 = tpu.dynamic_rotate %44 by %c240_i32_28 dim 1 : vector<24x256xf32>, i32 -> vector<24x256xf32>
      %c16_i32_29 = arith.constant 16 : i32
      %46 = tpu.dynamic_rotate %44 by %c16_i32_29 dim 1 : vector<24x256xf32>, i32 -> vector<24x256xf32>
      %47 = vector.shape_cast %22 : vector<1x256xi1> to vector<1x256xi1>
      %48 = vector.broadcast %47 : vector<1x256xi1> to vector<24x256xi1>
      %49 = arith.select %48, %45, %46 : vector<24x256xi1>, vector<24x256xf32>
      %50 = vector.shape_cast %24 : vector<1x256xi1> to vector<1x256xi1>
      %51 = vector.broadcast %50 : vector<1x256xi1> to vector<24x256xi1>
      %52 = arith.select %51, %46, %45 : vector<24x256xi1>, vector<24x256xf32>
      %c255_i32 = arith.constant 255 : i32
      %53 = tpu.dynamic_rotate %49 by %c255_i32 dim 1 : vector<24x256xf32>, i32 -> vector<24x256xf32>
      %c1_i32_30 = arith.constant 1 : i32
      %54 = tpu.dynamic_rotate %49 by %c1_i32_30 dim 1 : vector<24x256xf32>, i32 -> vector<24x256xf32>
      %55 = vector.shape_cast %18 : vector<1x256xi1> to vector<1x256xi1>
      %56 = vector.broadcast %55 : vector<1x256xi1> to vector<24x256xi1>
      %57 = arith.select %56, %53, %54 : vector<24x256xi1>, vector<24x256xf32>
      %58 = vector.shape_cast %20 : vector<1x256xi1> to vector<1x256xi1>
      %59 = vector.broadcast %58 : vector<1x256xi1> to vector<24x256xi1>
      %60 = arith.select %59, %54, %53 : vector<24x256xi1>, vector<24x256xf32>
      %c255_i32_31 = arith.constant 255 : i32
      %61 = tpu.dynamic_rotate %44 by %c255_i32_31 dim 1 : vector<24x256xf32>, i32 -> vector<24x256xf32>
      %c1_i32_32 = arith.constant 1 : i32
      %62 = tpu.dynamic_rotate %44 by %c1_i32_32 dim 1 : vector<24x256xf32>, i32 -> vector<24x256xf32>
      %63 = vector.shape_cast %18 : vector<1x256xi1> to vector<1x256xi1>
      %64 = vector.broadcast %63 : vector<1x256xi1> to vector<24x256xi1>
      %65 = arith.select %64, %61, %62 : vector<24x256xi1>, vector<24x256xf32>
      %66 = vector.shape_cast %20 : vector<1x256xi1> to vector<1x256xi1>
      %67 = vector.broadcast %66 : vector<1x256xi1> to vector<24x256xi1>
      %68 = arith.select %67, %62, %61 : vector<24x256xi1>, vector<24x256xf32>
      %c255_i32_33 = arith.constant 255 : i32
      %69 = tpu.dynamic_rotate %52 by %c255_i32_33 dim 1 : vector<24x256xf32>, i32 -> vector<24x256xf32>
      %c1_i32_34 = arith.constant 1 : i32
      %70 = tpu.dynamic_rotate %52 by %c1_i32_34 dim 1 : vector<24x256xf32>, i32 -> vector<24x256xf32>
      %71 = vector.shape_cast %18 : vector<1x256xi1> to vector<1x256xi1>
      %72 = vector.broadcast %71 : vector<1x256xi1> to vector<24x256xi1>
      %73 = arith.select %72, %69, %70 : vector<24x256xi1>, vector<24x256xf32>
      %74 = vector.shape_cast %20 : vector<1x256xi1> to vector<1x256xi1>
      %75 = vector.broadcast %74 : vector<1x256xi1> to vector<24x256xi1>
      %76 = arith.select %75, %70, %69 : vector<24x256xi1>, vector<24x256xf32>
      %77 = tpu.concatenate %57, %49, %60, %65, %44, %68, %73, %52, %76 in 0 : vector<24x256xf32>, vector<24x256xf32>, vector<24x256xf32>, vector<24x256xf32>, vector<24x256xf32>, vector<24x256xf32>, vector<24x256xf32>, vector<24x256xf32>, vector<24x256xf32> -> vector<216x256xf32>
      %78 = arith.truncf %77 : vector<216x256xf32> to vector<216x256xbf16>
      %cst_35 = arith.constant dense<0.000000e+00> : vector<32x256xf32>
      %79 = tpu.matmul %25, %78, %cst_35 {dimension_numbers = #tpu.dot_dimension_numbers<[1], [0], [0], [1], [0, 0, 1, 1], [], []>} : vector<32x216xbf16>, vector<216x256xbf16>, vector<32x256xf32> -> vector<32x256xf32>
      %80 = vector.broadcast %27 : vector<32x1xf32> to vector<32x256xf32>
      %81 = arith.addf %79, %80 : vector<32x256xf32>
      %82 = vector.extract_strided_slice %81 {offsets = [0, 0], sizes = [8, 256], strides = [1, 1]} : vector<32x256xf32> to vector<8x256xf32>
      %83 = arith.negf %82 : vector<8x256xf32>
      %84 = math.exp %83 : vector<8x256xf32>
      %cst_36 = arith.constant 1.000000e+00 : f32
      %85 = vector.broadcast %cst_36 : f32 to vector<8x256xf32>
      %86 = arith.addf %85, %84 : vector<8x256xf32>
      %87 = arith.divf %85, %86 : vector<8x256xf32>
      %88 = vector.extract_strided_slice %81 {offsets = [8, 0], sizes = [8, 256], strides = [1, 1]} : vector<32x256xf32> to vector<8x256xf32>
      %89 = arith.negf %88 : vector<8x256xf32>
      %90 = math.exp %89 : vector<8x256xf32>
      %cst_37 = arith.constant 1.000000e+00 : f32
      %91 = vector.broadcast %cst_37 : f32 to vector<8x256xf32>
      %92 = arith.addf %91, %90 : vector<8x256xf32>
      %93 = arith.divf %91, %92 : vector<8x256xf32>
      %94 = vector.extract_strided_slice %81 {offsets = [16, 0], sizes = [8, 256], strides = [1, 1]} : vector<32x256xf32> to vector<8x256xf32>
      %95 = math.tanh %94 : vector<8x256xf32>
      %96 = vector.extract_strided_slice %81 {offsets = [24, 0], sizes = [8, 256], strides = [1, 1]} : vector<32x256xf32> to vector<8x256xf32>
      %97 = arith.negf %96 : vector<8x256xf32>
      %98 = math.exp %97 : vector<8x256xf32>
      %cst_38 = arith.constant 1.000000e+00 : f32
      %99 = vector.broadcast %cst_38 : f32 to vector<8x256xf32>
      %100 = arith.addf %99, %98 : vector<8x256xf32>
      %101 = arith.divf %99, %100 : vector<8x256xf32>
      %102 = arith.mulf %93, %arg12 : vector<8x256xf32>
      %103 = arith.mulf %87, %95 : vector<8x256xf32>
      %104 = arith.addf %102, %103 : vector<8x256xf32>
      %105 = math.tanh %104 : vector<8x256xf32>
      %106 = arith.mulf %101, %105 : vector<8x256xf32>
      %107 = tpu.concatenate %106, %arg11 in 0 : vector<8x256xf32>, vector<8x256xf32> -> vector<16x256xf32>
      %cst_39 = arith.constant dense<0.000000e+00> : vector<16xf32>
      %108 = vector.multi_reduction <add>, %107, %cst_39 [1] : vector<16x256xf32> to vector<16xf32>
      %109 = vector.shape_cast %108 : vector<16xf32> to vector<16x1xf32>
      %cst_40 = arith.constant 3.906250e-03 : f32
      %110 = vector.broadcast %cst_40 : f32 to vector<16x1xf32>
      %111 = arith.mulf %109, %110 : vector<16x1xf32>
      %112 = arith.mulf %107, %107 : vector<16x256xf32>
      %cst_41 = arith.constant dense<0.000000e+00> : vector<16xf32>
      %113 = vector.multi_reduction <add>, %112, %cst_41 [1] : vector<16x256xf32> to vector<16xf32>
      %114 = vector.shape_cast %113 : vector<16xf32> to vector<16x1xf32>
      %cst_42 = arith.constant 3.906250e-03 : f32
      %115 = vector.broadcast %cst_42 : f32 to vector<16x1xf32>
      %116 = arith.mulf %114, %115 : vector<16x1xf32>
      %117 = arith.mulf %111, %111 : vector<16x1xf32>
      %118 = arith.subf %116, %117 : vector<16x1xf32>
      %cst_43 = arith.constant 9.99999974E-6 : f32
      %119 = vector.broadcast %cst_43 : f32 to vector<16x1xf32>
      %120 = arith.addf %118, %119 : vector<16x1xf32>
      %121 = math.rsqrt %120 : vector<16x1xf32>
      %122 = arith.mulf %121, %29 : vector<16x1xf32>
      %123 = vector.broadcast %122 : vector<16x1xf32> to vector<16x256xf32>
      %124 = arith.mulf %107, %123 : vector<16x256xf32>
      %125 = arith.mulf %111, %122 : vector<16x1xf32>
      %126 = arith.subf %30, %125 : vector<16x1xf32>
      %127 = vector.broadcast %126 : vector<16x1xf32> to vector<16x256xf32>
      %128 = arith.addf %124, %127 : vector<16x256xf32>
      %129 = tpu.concatenate %128, %arg13 in 0 : vector<16x256xf32>, vector<8x256xf32> -> vector<24x256xf32>
      %c240_i32_44 = arith.constant 240 : i32
      %130 = tpu.dynamic_rotate %129 by %c240_i32_44 dim 1 : vector<24x256xf32>, i32 -> vector<24x256xf32>
      %c16_i32_45 = arith.constant 16 : i32
      %131 = tpu.dynamic_rotate %129 by %c16_i32_45 dim 1 : vector<24x256xf32>, i32 -> vector<24x256xf32>
      %132 = vector.shape_cast %22 : vector<1x256xi1> to vector<1x256xi1>
      %133 = vector.broadcast %132 : vector<1x256xi1> to vector<24x256xi1>
      %134 = arith.select %133, %130, %131 : vector<24x256xi1>, vector<24x256xf32>
      %135 = vector.shape_cast %24 : vector<1x256xi1> to vector<1x256xi1>
      %136 = vector.broadcast %135 : vector<1x256xi1> to vector<24x256xi1>
      %137 = arith.select %136, %131, %130 : vector<24x256xi1>, vector<24x256xf32>
      %c255_i32_46 = arith.constant 255 : i32
      %138 = tpu.dynamic_rotate %134 by %c255_i32_46 dim 1 : vector<24x256xf32>, i32 -> vector<24x256xf32>
      %c1_i32_47 = arith.constant 1 : i32
      %139 = tpu.dynamic_rotate %134 by %c1_i32_47 dim 1 : vector<24x256xf32>, i32 -> vector<24x256xf32>
      %140 = vector.shape_cast %18 : vector<1x256xi1> to vector<1x256xi1>
      %141 = vector.broadcast %140 : vector<1x256xi1> to vector<24x256xi1>
      %142 = arith.select %141, %138, %139 : vector<24x256xi1>, vector<24x256xf32>
      %143 = vector.shape_cast %20 : vector<1x256xi1> to vector<1x256xi1>
      %144 = vector.broadcast %143 : vector<1x256xi1> to vector<24x256xi1>
      %145 = arith.select %144, %139, %138 : vector<24x256xi1>, vector<24x256xf32>
      %c255_i32_48 = arith.constant 255 : i32
      %146 = tpu.dynamic_rotate %129 by %c255_i32_48 dim 1 : vector<24x256xf32>, i32 -> vector<24x256xf32>
      %c1_i32_49 = arith.constant 1 : i32
      %147 = tpu.dynamic_rotate %129 by %c1_i32_49 dim 1 : vector<24x256xf32>, i32 -> vector<24x256xf32>
      %148 = vector.shape_cast %18 : vector<1x256xi1> to vector<1x256xi1>
      %149 = vector.broadcast %148 : vector<1x256xi1> to vector<24x256xi1>
      %150 = arith.select %149, %146, %147 : vector<24x256xi1>, vector<24x256xf32>
      %151 = vector.shape_cast %20 : vector<1x256xi1> to vector<1x256xi1>
      %152 = vector.broadcast %151 : vector<1x256xi1> to vector<24x256xi1>
      %153 = arith.select %152, %147, %146 : vector<24x256xi1>, vector<24x256xf32>
      %c255_i32_50 = arith.constant 255 : i32
      %154 = tpu.dynamic_rotate %137 by %c255_i32_50 dim 1 : vector<24x256xf32>, i32 -> vector<24x256xf32>
      %c1_i32_51 = arith.constant 1 : i32
      %155 = tpu.dynamic_rotate %137 by %c1_i32_51 dim 1 : vector<24x256xf32>, i32 -> vector<24x256xf32>
      %156 = vector.shape_cast %18 : vector<1x256xi1> to vector<1x256xi1>
      %157 = vector.broadcast %156 : vector<1x256xi1> to vector<24x256xi1>
      %158 = arith.select %157, %154, %155 : vector<24x256xi1>, vector<24x256xf32>
      %159 = vector.shape_cast %20 : vector<1x256xi1> to vector<1x256xi1>
      %160 = vector.broadcast %159 : vector<1x256xi1> to vector<24x256xi1>
      %161 = arith.select %160, %155, %154 : vector<24x256xi1>, vector<24x256xf32>
      %162 = tpu.concatenate %142, %134, %145, %150, %129, %153, %158, %137, %161 in 0 : vector<24x256xf32>, vector<24x256xf32>, vector<24x256xf32>, vector<24x256xf32>, vector<24x256xf32>, vector<24x256xf32>, vector<24x256xf32>, vector<24x256xf32>, vector<24x256xf32> -> vector<216x256xf32>
      %163 = arith.truncf %162 : vector<216x256xf32> to vector<216x256xbf16>
      %cst_52 = arith.constant dense<0.000000e+00> : vector<32x256xf32>
      %164 = tpu.matmul %26, %163, %cst_52 {dimension_numbers = #tpu.dot_dimension_numbers<[1], [0], [0], [1], [0, 0, 1, 1], [], []>} : vector<32x216xbf16>, vector<216x256xbf16>, vector<32x256xf32> -> vector<32x256xf32>
      %165 = vector.broadcast %28 : vector<32x1xf32> to vector<32x256xf32>
      %166 = arith.addf %164, %165 : vector<32x256xf32>
      %167 = vector.extract_strided_slice %166 {offsets = [0, 0], sizes = [8, 256], strides = [1, 1]} : vector<32x256xf32> to vector<8x256xf32>
      %168 = arith.negf %167 : vector<8x256xf32>
      %169 = math.exp %168 : vector<8x256xf32>
      %cst_53 = arith.constant 1.000000e+00 : f32
      %170 = vector.broadcast %cst_53 : f32 to vector<8x256xf32>
      %171 = arith.addf %170, %169 : vector<8x256xf32>
      %172 = arith.divf %170, %171 : vector<8x256xf32>
      %173 = vector.extract_strided_slice %166 {offsets = [8, 0], sizes = [8, 256], strides = [1, 1]} : vector<32x256xf32> to vector<8x256xf32>
      %174 = arith.negf %173 : vector<8x256xf32>
      %175 = math.exp %174 : vector<8x256xf32>
      %cst_54 = arith.constant 1.000000e+00 : f32
      %176 = vector.broadcast %cst_54 : f32 to vector<8x256xf32>
      %177 = arith.addf %176, %175 : vector<8x256xf32>
      %178 = arith.divf %176, %177 : vector<8x256xf32>
      %179 = vector.extract_strided_slice %166 {offsets = [16, 0], sizes = [8, 256], strides = [1, 1]} : vector<32x256xf32> to vector<8x256xf32>
      %180 = math.tanh %179 : vector<8x256xf32>
      %181 = vector.extract_strided_slice %166 {offsets = [24, 0], sizes = [8, 256], strides = [1, 1]} : vector<32x256xf32> to vector<8x256xf32>
      %182 = arith.negf %181 : vector<8x256xf32>
      %183 = math.exp %182 : vector<8x256xf32>
      %cst_55 = arith.constant 1.000000e+00 : f32
      %184 = vector.broadcast %cst_55 : f32 to vector<8x256xf32>
      %185 = arith.addf %184, %183 : vector<8x256xf32>
      %186 = arith.divf %184, %185 : vector<8x256xf32>
      %187 = arith.mulf %178, %arg13 : vector<8x256xf32>
      %188 = arith.mulf %172, %180 : vector<8x256xf32>
      %189 = arith.addf %187, %188 : vector<8x256xf32>
      %190 = math.tanh %189 : vector<8x256xf32>
      %191 = arith.mulf %186, %190 : vector<8x256xf32>
      scf.yield %106, %191, %104, %189 : vector<8x256xf32>, vector<8x256xf32>, vector<8x256xf32>, vector<8x256xf32>
    }
    %c8_i32_21 = arith.constant 8 : i32
    %c0_22 = arith.constant 0 : index
    %c0_23 = arith.constant 0 : index
    %c0_24 = arith.constant 0 : index
    %37 = vector.load %arg8[%c0_22, %c0_23, %c0_24] : memref<1x8x256xf32, #tpu.memory_space<vmem>>, vector<1x8x256xf32>
    %38 = vector.shape_cast %37 : vector<1x8x256xf32> to vector<8x256xf32>
    %39 = vector.shape_cast %36#1 : vector<8x256xf32> to vector<1x8x256xf32>
    tpu.vector_store %arg8[%c0_22, %c0_23, %c0_24], %39 {strides = array<i32>} : memref<1x8x256xf32, #tpu.memory_space<vmem>>, vector<1x8x256xf32>,
    return
  }
  func.func @transform_0(%arg0: i32) -> (i32, i32, i32, i32) {
    %c0_i32 = arith.constant 0 : i32
    %c0_i32_0 = arith.constant 0 : i32
    %c0_i32_1 = arith.constant 0 : i32
    %c0_i32_2 = arith.constant 0 : i32
    return %arg0, %c0_i32, %c0_i32_0, %c0_i32_1 : i32, i32, i32, i32
  }
  func.func @transform_1(%arg0: i32) -> (i32, i32) {
    %c0_i32 = arith.constant 0 : i32
    %c0_i32_0 = arith.constant 0 : i32
    %c0_i32_1 = arith.constant 0 : i32
    return %c0_i32, %c0_i32_0 : i32, i32
  }
  func.func @transform_2(%arg0: i32) -> (i32, i32) {
    %c0_i32 = arith.constant 0 : i32
    %c0_i32_0 = arith.constant 0 : i32
    %c0_i32_1 = arith.constant 0 : i32
    return %c0_i32, %c0_i32_0 : i32, i32
  }
  func.func @transform_3(%arg0: i32) -> (i32, i32) {
    %c0_i32 = arith.constant 0 : i32
    %c0_i32_0 = arith.constant 0 : i32
    %c0_i32_1 = arith.constant 0 : i32
    return %c0_i32, %c0_i32_0 : i32, i32
  }
  func.func @transform_4(%arg0: i32) -> (i32, i32) {
    %c0_i32 = arith.constant 0 : i32
    %c0_i32_0 = arith.constant 0 : i32
    %c0_i32_1 = arith.constant 0 : i32
    return %c0_i32, %c0_i32_0 : i32, i32
  }
  func.func @transform_5(%arg0: i32) -> (i32, i32) {
    %c0_i32 = arith.constant 0 : i32
    %c0_i32_0 = arith.constant 0 : i32
    %c0_i32_1 = arith.constant 0 : i32
    return %c0_i32, %c0_i32_0 : i32, i32
  }
  func.func @transform_6(%arg0: i32) -> (i32, i32) {
    %c0_i32 = arith.constant 0 : i32
    %c0_i32_0 = arith.constant 0 : i32
    %c0_i32_1 = arith.constant 0 : i32
    return %c0_i32, %c0_i32_0 : i32, i32
  }
  func.func @transform_7(%arg0: i32) -> (i32, i32, i32) {
    %c0_i32 = arith.constant 0 : i32
    %c0_i32_0 = arith.constant 0 : i32
    %c0_i32_1 = arith.constant 0 : i32
    return %arg0, %c0_i32, %c0_i32_0 : i32, i32, i32
  }
}

</mosaic_0001>

<bundles_post_ra>
// kernel: tpu_custom_call.1
= control target key start
LH: loop header
LB: loop body
LE: loop exit
PB: predicated region body
PF: predicated region fallthrough
CT: control target
= control target key end

     0   :  { %12 = vsyncpa [#allocation3], 0  ;;  %s3084_s0 = inlined_call_operand.hbm [shape: f32[2,8,8,256], index: 0, kind: input, shape index: {}]   ;;  %s3085_s1 = inlined_call_operand.vmem [shape: bf16[32,216], index: 1, kind: input, shape index: {}]   ;;  %s3086_s2 = inlined_call_operand.vmem [shape: f32[32,1], index: 2, kind: input, shape index: {}]   ;;  %s3087_s3 = inlined_call_operand.vmem [shape: bf16[32,216], index: 3, kind: input, shape index: {}]   ;;  %s3088_s4 = inlined_call_operand.vmem [shape: f32[32,1], index: 4, kind: input, shape index: {}]   ;;  %s3089_s5 = inlined_call_operand.vmem [shape: f32[16,1], index: 5, kind: input, shape index: {}]   ;;  %s3090_s6 = inlined_call_operand.vmem [shape: f32[16,1], index: 6, kind: input, shape index: {}]   ;;  %s3091_s7 = inlined_call_operand.hbm [shape: f32[2,8,256], index: 7, kind: output, shape index: {}]  }
   0x1   :  { %14 = vsyncpa [#allocation3 + $0x1], 0 }
   0x2   :  { %15 = vsyncpa [#allocation4], 0 }
   0x3   :  { %17 = vsyncpa [#allocation4 + $0x1], 0  ;;  %s2010_s24 = smov 0   ;;  %s2012_s25 = smov 0  }
   0x4   :  { %s2014_s26 = smov 0   ;;  %s2016_s27 = smov 0  }
   0x5 LB: > { %s2031_s28 = sadd.s32 4294967295, %s1923_s27   ;;  %s1315_s29 = sadd.s32 4294967294, %s1923_s27   ;;  %s1923_s27 = sphi %s2016_s27, %s3162_s27   ;;  %s1919_s26 = sphi %s2014_s26, %s3161_s26   ;;  %s1915_s25 = sphi %s2012_s25, %s3160_s25   ;;  %s1911_s24 = sphi %s2010_s24, %s3159_s24  }
   0x6   : > { %s2035_s30 = sadd.s32 1, %s1923_s27   ;;  %s30_s8 = sadd.s32 1, %s1919_s26 }
   0x7   : > { %s27_s9 = ssub.s32 %s1923_s27, %s2035_s30  ;;  %p37_p0 = scmp.ne.s32.totalorder %s1919_s26, %s1915_s25 }
   0x8   : > { %p28_p1 = scmp.eq.s32.totalorder %s27_s9, 0  ;;  %p38_p2 = scmp.eq.s32.totalorder %s1923_s27, 0 }
   0x9   : > { %p43_p3 = scmp.ne.s32.totalorder %s1915_s25, %s1911_s24  ;;  %p44_p4 = scmp.eq.s32.totalorder %s2031_s28, 0 }
   0xa   : > { %s2047_s10 = scalar_select %p28_p1, %s1919_s26, %s30_s8  }
   0xb   : > { %p2049_p5 = por %p38_p2, %p37_p0  ;;  %p2053_p6 = por %p44_p4, %p43_p3 }
   0xc   : > { %p193_p7 = scmp.eq.s32.totalorder %s2031_s28, 1  ;;  %p199_p8 = scmp.eq.s32.totalorder %s1315_s29, 1 }
   0xd   : > { %s3103_s12 = scalar_select %p2053_p6, 1, 0 }
   0xe   : > { %p1372_p10 = scmp.lt.s32.totalorder %s1923_s27, 2  ;;  %p2060_p11 = por %p193_p7, %p37_p0 }
   0xf   : > { %p2064_p12 = por %p199_p8, %p43_p3  ;;  %s237_s15 = sand.u32 1, %s1919_s26  }
  0x10   : > { %s3104_s13 = scalar_select %p2060_p11, 1, 0 }
  0x11   : > { %s3105_s14 = scalar_select %p2064_p12, 1, 0 }
  0x12   : > { %s1357_s16 = sshll.u32 %s1923_s27, 11  ;;  %s1318_s17 = sshll.u32 %s237_s15, 7 }
  0x13   : > { %s2073_s20 = scalar_lea.hbm %s3084_s0, %s1357_s16  ;;  %s241_s21 = scalar_lea.vmem [#allocation2], %s1318_s17 }
  0x14   : > { %s248_s22 = sshll.u32 %s241_s21, 4  ;;  %p2077_p13 = pnand %p1372_p10, %p2049_p5  ;;  %s2081_s22 = int_to_ptr.vmem [resolvable:$true] %s248_s22 }
  0x15   : > { %s2083_s29 = scalar_lea.sflag [#allocation3], %s237_s15  ;;  %s1795_s8 = scalar_lea.hbm %s2073_s20, 2048 }
  0x16   : > { %p1796_p0 = scmp.ne.s32.totalorder %s2073_s20, %s1795_s8  ;;  %p1797_p1 = pneg %p2077_p13 }
  0x17   : > { %s1800_s17 = scalar_lea.hbm %s3084_s0, 4096  ;;  %p1801_p4 = scmp.lt.s32.totalorder %s2073_s20, %s3084_s0 }
  0x18   : > { %p1798_p2 = pnand %p1797_p1, %p1796_p0  ;;  %p1802_p5 = scmp.lt.s32.totalorder %s1800_s17, %s1795_s8 }
  0x1a   : > { %p1799_p3 = pneg %p1798_p2  ;;  %p1803_p7 = por %p1802_p5, %p1801_p4 }
  0x1c   : > { %p1804_p8 = pnand %p1803_p7, %p1799_p3 }
  0x1e   : > { %1807 = shalt.err (!%p1804_p8)
}
  0x1f   : > { %s1808_s15 = scalar_lea.vmem %s2081_s22, 2048  ;;  %s1961_s19 = smov [#allocation2]  }
  0x20   : > { %p1809_p10 = scmp.ne.s32.totalorder %s2081_s22, %s1808_s15  ;;  %s1813_s21 = sshll.u32 %s1961_s19, 4  ;;  %s1814_s21 = int_to_ptr.vmem [resolvable:$false] %s1813_s21 }
  0x21   : > { %s1815_s9 = scalar_lea.vmem %s1814_s21, 4096  ;;  %p1816_p2 = scmp.lt.s32.totalorder %s2081_s22, %s1814_s21 }
  0x22   : > { %p1811_p9 = pnand %p1809_p10, %p1797_p1  ;;  %p1817_p12 = scmp.lt.s32.totalorder %s1815_s9, %s1808_s15 }
  0x24   : > { %p1812_p0 = pneg %p1811_p9  ;;  %p1818_p11 = por %p1817_p12, %p1816_p2 }
  0x26   : > { %p1819_p6 = pnand %p1818_p11, %p1812_p0 }
  0x28   : > { %1822 = shalt.err (!%p1819_p6)
}
  0x29   : > { %s1962_s8 = smov 256   ;;  %s1963_s16 = smov 16  }
  0x2a   : > { %1367 = dma.hbm_to_vmem [thread:$0]  (!%p2077_p13), %s2073_s20, 2048, %s2081_s22, %s2083_s29, %s1962_s8, %s1962_s8, %s1963_s16  }
  0x2b   : > { %p1321_p9 = scmp.ge.s32.totalorder %s1923_s27, 1  ;;  %p256_p1 = scmp.lt.s32.totalorder %s1923_s27, 3 }
  0x2d   : > { %p257_p3 = pnand %p1321_p9, %p256_p1 }
  0x2f   : > { %260 = sbr.rel (%p257_p3) target bundleno = 1473 (0x5c1), region = 48 }
  0x34   : > { %s2107_s17 = sand.u32 1, %s1915_s25   ;;  %p3107_p6 = scmp.ne.s32.totalorder %s3103_s12, 0 }
  0x35   : > { %s1322_s11 = sshll.u32 %s2107_s17, 7  ;;  %s263_s18 = scalar_lea.sflag [#allocation3], %s2107_s17 }
  0x36   : > { %s2111_s15 = scalar_lea.vmem [#allocation2], %s1322_s11 }
  0x37   : > { %1902 = dma.done.wait (%p3107_p6), %s263_s18, 2048  }
  0x38   : > { %1904 = vsyncadd (%p3107_p6), %s263_s18, 4294965248  ;;  %s1323_s20 = sshll.u32 %s2107_s17, 4  ;;  %v298_v0 = vlaneseq  ;;  %v2138_v7 = vld [vmem:[%s3085_s1] sm:$0xff]  ;;  %v2143_v8 = vld [vmem:[%s3085_s1 + $0x8] sm:$0xff]  ;;  %v2247_v29 = vmov 0.0   ;;  %v2249_v30 = vmov 0.0  }
  0x39   : > { %3113 = vst [vmem:[#allocation9_spill] sm:$0xff] %v2138_v7  ;;  %3114 = vst [vmem:[#allocation10_spill] sm:$0xff] %v2143_v8  ;;  %v2148_v9 = vld [vmem:[%s3085_s1 + $0x10] sm:$0xff]  ;;  %v2153_v10 = vld [vmem:[%s3085_s1 + $0x18] sm:$0xff]  ;;  %s2245_s8 = scalar_lea.vmem [#allocation5], %s1323_s20  ;;  %v2251_v31 = vmov 0.0  }
  0x3a   : > { %v2118_v1 = vand.u32 127, %v298_v0  ;;  %v2158_v11 = vld [vmem:[%s3087_s3] sm:$0xff]  ;;  %v2163_v12 = vld [vmem:[%s3087_s3 + $0x8] sm:$0xff]  ;;  %v2176_v15 = vld [vmem:[%s3087_s3 + $0x10] sm:$0xff]  ;;  %v2253_v32 = vmov 0.0   ;;  %v2255_v33 = vmov 0.0  }
  0x3b   : > { %3115 = vst [vmem:[#allocation11_spill] sm:$0xff] %v2158_v11  ;;  %3116 = vst [vmem:[#allocation12_spill] sm:$0xff] %v2163_v12  ;;  %v2181_v16 = vld [vmem:[%s3087_s3 + $0x18] sm:$0xff]  ;;  %v2186_v17 = vld [vmem:[%s3086_s2] sm:$0xff]  ;;  %v2257_v34 = vmov 0.0   ;;  %v2259_v35 = vmov 0.0  }
  0x3c   : > { %v2121_v2 = vadd.s32 128, %v2118_v1  ;;  %v305_v3 = vand.u32 15, %v2118_v1  ;;  %vm329_vm0 = vcmp.lt.s32.totalorder %v2118_v1, 16  ;;  %3121 = vst [vmem:[#allocation13_spill] sm:$0xff] %v2176_v15  ;;  %3122 = vst [vmem:[#allocation14_spill] sm:$0xff] %v2181_v16  ;;  %v2191_v18 = vld [vmem:[%s3086_s2 + $0x8] sm:$0xff] }
  0x3d   : > { %3123 = vst [vmem:[#allocation15_spill] sm:$0xff] %v2186_v17  ;;  %3124 = vst [vmem:[#allocation16_spill] sm:$0xff] %v2191_v18  ;;  %v2196_v19 = vld [vmem:[%s3086_s2 + $0x10] sm:$0xff]  ;;  %v2201_v20 = vld [vmem:[%s3086_s2 + $0x18] sm:$0xff]  ;;  %v2261_v36 = vmov 0.0   ;;  %s2263_s16 = smov 0  }
  0x3e   : > { %3108 = vst [vmem:[#allocation8_spill] sm:$0xff] %v2121_v2  ;;  %v312_v4 = vand.u32 15, %v2121_v2  ;;  %vm2126_vm1 = vcmp.eq.s32.totalorder %v305_v3, 0  ;;  %vm2130_vm2 = vcmp.eq.s32.totalorder %v305_v3, 15  ;;  %vm332_vm3 = vcmp.ge.s32.totalorder %v2121_v2, 240  ;;  %3125 = vst [vmem:[#allocation17_spill] sm:$0xff] %v2196_v19 }
  0x3f   : > { %3126 = vst [vmem:[#allocation18_spill] sm:$0xff] %v2201_v20  ;;  %v2206_v21 = vld [vmem:[%s3088_s4] sm:$0xff]  ;;  %v2211_v22 = vld [vmem:[%s3088_s4 + $0x8] sm:$0xff]  ;;  %v2216_v23 = vld [vmem:[%s3088_s4 + $0x10] sm:$0xff] }
  0x40   : > { %vm2165_vm4 = vcmp.eq.s32.totalorder %v312_v4, 0  ;;  %vm2169_vm5 = vcmp.eq.s32.totalorder %v312_v4, 15  ;;  %3127 = vst [vmem:[#allocation19_spill] sm:$0xff] %v2206_v21  ;;  %3128 = vst [vmem:[#allocation20_spill] sm:$0xff] %v2216_v23  ;;  %v2221_v24 = vld [vmem:[%s3088_s4 + $0x18] sm:$0xff]  ;;  %v2226_v25 = vld [vmem:[%s3089_s5] sm:$0xff] }
  0x41   : > { %3129 = vst [vmem:[#allocation21_spill] sm:$0xff] %v2221_v24  ;;  %v2231_v26 = vld [vmem:[%s3089_s5 + $0x8] sm:$0xff]  ;;  %v2236_v27 = vld [vmem:[%s3090_s6] sm:$0xff] }
  0x42   : > { %v2241_v28 = vld [vmem:[%s3090_s6 + $0x8] sm:$0xff] }
  0x43 LB: >> { %v3130_v8 = vld [vmem:[#allocation10_spill] sm:$0xff]  ;;  %v3131_v7 = vld [vmem:[#allocation9_spill] sm:$0xff]  ;;  %v1485_v37 = vpack.i.bf16 %v1935_v31, %v1939_v32  ;;  %s1358_s20 = sshll.u32 %s1959_s16, 4  ;;  %s1964_s18 = smov 112   ;;  %v1525_v43 = vpack.i.bf16 %v1939_v32, %v1955_v36  ;;  %v1530_v44 = vpack.i.bf16 %v1935_v31, %v1951_v35  ;;  %vm384_vm6 = vcmp.lt.s32.totalorder %v2118_v1, 112  ;;  %v1935_v31 = vphi %v2251_v31, %v2662_v31   ;;  %v1931_v30 = vphi %v2249_v30, %v1191_v30   ;;  %v1927_v29 = vphi %v2247_v29, %v1192_v29   ;;  %s1959_s16 = sphi %s2263_s16, %s358_s16   ;;  %v1955_v36 = vphi %v2261_v36, %v2665_v36   ;;  %v1951_v35 = vphi %v2259_v35, %v2667_v35   ;;  %v1947_v34 = vphi %v2257_v34, %v3155_v34   ;;  %v1943_v33 = vphi %v2255_v33, %v3154_v33   ;;  %v1939_v32 = vphi %v2253_v32, %v2658_v32  }
  0x44   : >> { %s369_s11 = scalar_lea.vmem %s2111_s15, %s1358_s20 [#allocation2]  ;;  %s1965_s12 = smov 16   ;;  %vm441_vm7 = vcmp.lt.s32.totalorder %v2118_v1, 127  ;;  %vm460_vm8 = vcmp.lt.s32.totalorder %v2118_v1, 1  ;;  %vm649_vm9 = vcmask 719872   ;;  %v3135_v17 = vld [vmem:[#allocation15_spill] sm:$0xff]  ;;  %v3136_v18 = vld [vmem:[#allocation16_spill] sm:$0xff] }
  0x45   : >> { %1486 = vrot.lane.b32.xlu0 %v1485_v37, %s1964_s18  ;;  %v2297_v38 = vld [vmem:[%s369_s11] sm:$0xff]  ;;  %v2299_v39 = vld [vmem:[%s369_s11 + $0x8] sm:$0xff]  ;;  %s1966_s22 = smov 127   ;;  %s1967_s23 = smov 1   ;;  %vm656_vm10 = vcmask 1043456  }
  0x46   : >> { %v1495_v40 = vpack.i.bf16 %v1955_v36, %v2297_v38  ;;  %v1500_v41 = vpack.i.bf16 %v1951_v35, %v2299_v39  ;;  %v1515_v42 = vpack.i.bf16 %v2299_v39, %v2297_v38  ;;  %v3137_v19 = vld [vmem:[#allocation17_spill] sm:$0xff]  ;;  %v3138_v20 = vld [vmem:[#allocation18_spill] sm:$0xff]  ;;  %s358_s16 = sadd.s32 1, %s1959_s16  }
  0x47   : >> { %p355_p11 = scmp.ge.s32.totalorder %s358_s16, 8  }
  0x48   : >> { %1496 = vrot.lane.b32.xlu1 %v1495_v40, %s1964_s18  ;;  %s1359_s29 = sshll.u32 (%p355_p11), %s2031_s28, 8  ;;  %s1214_s20 = sshll.u32 (%p355_p11), %s2245_s8, 4  ;;  %s1215_s20 = int_to_ptr.vmem [resolvable:$true] %s1214_s20 }
  0x49   : >> { %1491 = vrot.lane.b32.xlu0 %v1485_v37, %s1965_s12  ;;  %s1212_s9 = scalar_lea.hbm (%p355_p11), %s3091_s7, %s1359_s29  ;;  %s1200_s11 = scalar_lea.sflag (%p355_p11), [#allocation4], %s2107_s17 }
  0x4a   : > { %p3156_p13 = scmp.ne.s32.totalorder (%p355_p11), %s3104_s13, 0  ;;  %s1969_s15 = smov (%p355_p11), [#allocation5]  }
  0x4b   : > { %s1827_s16 = sshll.u32 (%p355_p11), %s1969_s15, 4  ;;  %s1828_s16 = int_to_ptr.vmem [resolvable:$false] %s1827_s16 }
  0x4c   : >> { %1501 = vrot.lane.b32.xlu1 %v1500_v41, %s1964_s18  ;;  %p1830_p7 = scmp.lt.s32.totalorder (%p355_p11), %s1215_s20, %s1828_s16 }
  0x4d   : >> { %1506 = vrot.lane.b32.xlu0 %v1495_v40, %s1965_s12 }
  0x50   : >> { %1511 = vrot.lane.b32.xlu1 %v1500_v41, %s1965_s12 }
  0x51   : >> { %1516 = vrot.lane.b32.xlu0 %v1515_v42, %s1966_s22 }
  0x54   : >> { %1521 = vrot.lane.b32.xlu1 %v1515_v42, %s1967_s23 }
  0x55   : >> { %1526 = vrot.lane.b32.xlu0 %v1525_v43, %s1966_s22 }
  0x58   : >> { %1531 = vrot.lane.b32.xlu1 %v1530_v44, %s1966_s22 }
  0x59   : >> { %1536 = vrot.lane.b32.xlu0 %v1525_v43, %s1967_s23 }
  0x5c   : >> { %1541 = vrot.lane.b32.xlu1 %v1530_v44, %s1967_s23 }
  0xb7   : >> { %v1487_v47 = vpop.permute.xlu0 %1486 }
  0xb8   : >> { %v1489_v48 = vunpack.i.h.bf16 %v1487_v47  ;;  %v1488_v49 = vunpack.i.l.bf16 %v1487_v47 }
  0xba   : >> { %v2327_v50 = vpop.permute.xlu1 %1496  ;;  %v2331_v52 = vsel %vm384_vm6, %v1488_v49, %v1489_v48  ;;  %v390_v47 = vsel %vm384_vm6, %v1489_v48, %v1488_v49 }
  0xbb   : >> { %v1492_v51 = vpop.permute.xlu0 %1491  ;;  %v1499_v58 = vunpack.i.h.bf16 %v2327_v50  ;;  %v1498_v37 = vunpack.i.l.bf16 %v2327_v50 }
  0xbc   : >> { %v1494_v53 = vunpack.i.h.bf16 %v1492_v51  ;;  %v1493_v54 = vunpack.i.l.bf16 %v1492_v51 }
  0xbe   : >> { %v2335_v55 = vsel %vm329_vm0, %v1493_v54, %v1494_v53  ;;  %v408_v56 = vsel %vm329_vm0, %v1494_v53, %v1493_v54  ;;  %v1502_v57 = vpop.permute.xlu1 %1501 }
  0xbf   : >> { %v2343_v59 = vsel %vm329_vm0, %v2331_v52, %v408_v56  ;;  %v1504_v60 = vunpack.i.h.bf16 %v1502_v57  ;;  %v1507_v61 = vpop.permute.xlu0 %1506  ;;  %v1503_v62 = vunpack.i.l.bf16 %v1502_v57 }
  0xc0   : >> { %v1550_v63 = vpack.i.bf16 %v2335_v55, %v2343_v59  ;;  %v1509_v3 = vunpack.i.h.bf16 %v1507_v61  ;;  %v1508_v4 = vunpack.i.l.bf16 %v1507_v61 }
  0xc1   : >> { %v2349_v0 = vsel %vm384_vm6, %v1499_v58, %v1504_v60  ;;  %v2361_v51 = vsel %vm384_vm6, %v1498_v37, %v1503_v62 }
  0xc2   : >> { %v1512_v40 = vpop.permute.xlu1 %1511  ;;  %1551 = vrot.lane.b32.xlu1 %v1550_v63, %s1967_s23  ;;  %1546 = vrot.lane.b32.xlu0 %v1550_v63, %s1966_s22 }
  0xc3   : >> { %v1514_v41 = vunpack.i.h.bf16 %v1512_v40  ;;  %v1513_v42 = vunpack.i.l.bf16 %v1512_v40  ;;  %v1517_v43 = vpop.permute.xlu0 %1516  ;;  %v389_v40 = vsel %vm384_vm6, %v1504_v60, %v1499_v58 }
  0xc4   : >> { %v1519_v50 = vunpack.i.h.bf16 %v1517_v43  ;;  %v1518_v53 = vunpack.i.l.bf16 %v1517_v43 }
  0xc5   : >> { %v2365_v54 = vsel %vm329_vm0, %v1509_v3, %v1514_v41  ;;  %v407_v56 = vsel %vm329_vm0, %v1514_v41, %v1509_v3  ;;  %v2371_v57 = vsel %vm329_vm0, %v1508_v4, %v1513_v42  ;;  %v406_v48 = vsel %vm329_vm0, %v1513_v42, %v1508_v4 }
  0xc6   : >> { %v2378_v49 = vsel %vm329_vm0, %v2349_v0, %v407_v56  ;;  %v2383_v61 = vsel %vm329_vm0, %v2361_v51, %v406_v48  ;;  %v1555_v63 = vpack.i.bf16 %v2365_v54, %v2371_v57  ;;  %v1522_v3 = vpop.permute.xlu1 %1521  ;;  %v2395_v41 = vsel %vm332_vm3, %v2335_v55, %v390_v47 }
  0xc7   : >> { %v1560_v4 = vpack.i.bf16 %v2378_v49, %v2383_v61  ;;  %v1527_v42 = vpop.permute.xlu0 %1526  ;;  %v2401_v43 = vsel %vm332_vm3, %v2365_v54, %v389_v40  ;;  %v1524_v56 = vunpack.i.h.bf16 %v1522_v3  ;;  %v1523_v48 = vunpack.i.l.bf16 %v1522_v3 }
  0xc8   : >> { %1556 = vrot.lane.b32.xlu1 %v1555_v63, %s1966_s22  ;;  %v1529_v58 = vunpack.i.h.bf16 %v1527_v42  ;;  %v1528_v60 = vunpack.i.l.bf16 %v1527_v42  ;;  %v2406_v44 = vsel %vm441_vm7, %v1519_v50, %v1518_v53  ;;  %v2410_v47 = vsel %vm441_vm7, %v1518_v53, %v1519_v50 }
  0xc9   : >> { %1561 = vrot.lane.b32.xlu0 %v1560_v4, %s1966_s22  ;;  %v2414_v45 = vsel %vm460_vm8, %v1523_v48, %v1524_v56  ;;  %v2418_v3 = vsel %vm460_vm8, %v1524_v56, %v1523_v48  ;;  %v388_v48 = vsel %vm384_vm6, %v1503_v62, %v1498_v37  ;;  %v1580_v42 = vpack.i.bf16 %v2395_v41, %v2331_v52 }
  0xca   : >> { %v1532_v46 = vpop.permute.xlu1 %1531  ;;  %v530_v53 = vsel %vm2169_vm5, %v2414_v45, %v2406_v44  ;;  %v2446_v50 = vsel %vm332_vm3, %v2371_v57, %v388_v48 }
  0xcb   : >> { %v1534_v15 = vunpack.i.h.bf16 %v1532_v46  ;;  %v1533_v16 = vunpack.i.l.bf16 %v1532_v46  ;;  %v1537_v56 = vpop.permute.xlu0 %1536  ;;  %v598_v46 = vpack.c.bf16 %v530_v53, %v1935_v31 }
  0xcc   : >> { %1571 = vrot.lane.b32.xlu1 %v1555_v63, %s1967_s23  ;;  %v1539_v62 = vunpack.i.h.bf16 %v1537_v56  ;;  %v1538_v37 = vunpack.i.l.bf16 %v1537_v56  ;;  %v529_v63 = vsel %vm2130_vm2, %v2418_v3, %v2410_v47 }
  0xcd   : >> { %1566 = vrot.lane.b32.xlu0 %v1560_v4, %s1967_s23  ;;  %663 = vmatprep.subr.bf16.mxu0 %v598_v46  ;;  %v597_v11 = vpack.c.bf16 %v529_v63, %v1939_v32  ;;  %v503_v40 = vsel %vm441_vm7, %v1533_v16, %v1528_v60  ;;  %v504_v56 = vsel %vm441_vm7, %v1534_v15, %v1529_v58 }
  0xce   : >> { %v1542_v53 = vpop.permute.xlu1 %1541  ;;  %v500_v23 = vsel %vm441_vm7, %v1528_v60, %v1533_v16  ;;  %v1595_v46 = vpack.i.bf16 %v2401_v43, %v2446_v50  ;;  %v1585_v63 = vpack.i.bf16 %v2349_v0, %v2361_v51  ;;  %v501_v4 = vsel %vm441_vm7, %v1529_v58, %v1534_v15 }
  0xcf   : >> { %v1544_v12 = vunpack.i.h.bf16 %v1542_v53  ;;  %v1543_v48 = vunpack.i.l.bf16 %v1542_v53  ;;  %664 = vmatpush1.bf16.msra.mxu0 %v597_v11  ;;  %v3133_v53 = vpack.c.bf16 %v1951_v35, %v2299_v39 }
  0xd0   : >> { %1581 = vrot.lane.b32.xlu1 %v1580_v42, %s1967_s23 }
  0xd1   : >> { %1576 = vrot.lane.b32.xlu0 %v1580_v42, %s1966_s22  ;;  %665 = vmatprep.subr.bf16.mxu0 %v3133_v53  ;;  %v518_v16 = vsel %vm460_vm8, %v1538_v37, %v1543_v48  ;;  %v519_v60 = vsel %vm460_vm8, %v1539_v62, %v1544_v12  ;;  %v521_v24 = vsel %vm460_vm8, %v1543_v48, %v1538_v37 }
  0xd2   : >> { %v526_v11 = vsel %vm2165_vm4, %v503_v40, %v518_v16  ;;  %v528_v15 = vsel %vm2165_vm4, %v504_v56, %v519_v60  ;;  %v522_v58 = vsel %vm460_vm8, %v1544_v12, %v1539_v62  ;;  %v525_v35 = vsel %vm2126_vm1, %v500_v23, %v521_v24 }
  0xd3   : >> { %v594_v39 = vpack.c.bf16 %v528_v15, %v526_v11  ;;  %v527_v42 = vsel %vm2126_vm1, %v501_v4, %v522_v58  ;;  %v532_v53 = vsel %vm2169_vm5, %v518_v16, %v503_v40  ;;  %v534_v37 = vsel %vm2169_vm5, %v519_v60, %v504_v56 }
  0xd4   : >> { %1596 = vrot.lane.b32.xlu1 %v1595_v46, %s1966_s22  ;;  %v3134_v48 = vpack.c.bf16 %v1955_v36, %v2297_v38  ;;  %v593_v12 = vpack.c.bf16 %v527_v42, %v525_v35  ;;  %v2496_v62 = vpack.c.bf16 %v534_v37, %v532_v53  ;;  %v531_v11 = vsel %vm2130_vm2, %v521_v24, %v500_v23 }
  0xd5   : >> { %1586 = vrot.lane.b32.xlu0 %v1585_v63, %s1966_s22  ;;  %v533_v40 = vsel %vm2130_vm2, %v522_v58, %v501_v4  ;;  %v1327_v36 = vcombine.high %v3131_v7, %v3130_v8  ;;  %v1968_v23 = vmov 0   ;;  %v3139_v53 = vsel %vm2165_vm4, %v2406_v44, %v2414_v45 }
  0xd6   : >> { %666 = vmatpush1.bf16.msra.mxu0 %v3134_v48  ;;  %v2503_v16 = vpack.c.bf16 %v533_v40, %v531_v11  ;;  %1605 = vset.pattern.permute.xlu0 %v1968_v23  ;;  %v3140_v48 = vsel %vm2126_vm1, %v2410_v47, %v2418_v3 }
  0xd7   : >> { %667 = vmatprep.subr.bf16.mxu0 %v594_v39  ;;  %1331 = vmatprep.mubr.msk.bf16.mxu0 %vm649_vm9, %v1327_v36 }
  0xd8   : >> { %1601 = vrot.lane.b32.xlu1 %v1595_v46, %s1967_s23 }
  0xd9   : >> { %1591 = vrot.lane.b32.xlu0 %v1585_v63, %s1967_s23  ;;  %1606 = vset.pattern.permute.xlu1 %v1968_v23 }
  0xda   : >> { %668 = vmatpush1.bf16.msra.mxu0 %v593_v12 }
  0xdc   : >> { %618 = vperm.xlu1 %1606, %v3136_v18  }
  0xdd   : >> { %613 = vperm.xlu0 %1605, %v3135_v17  }
  0xe0   : >> { %623 = vperm.xlu1 %1606, %v3137_v19  }
  0xe1   : >> { %628 = vperm.xlu0 %1605, %v3138_v20  }
 0x134   : >> { %v1552_v24 = vpop.permute.xlu1 %1551  ;;  %v1547_v38 = vpop.permute.xlu0 %1546 }
 0x135   : >> { %v1554_v4 = vunpack.i.h.bf16 %v1552_v24  ;;  %v1553_v56 = vunpack.i.l.bf16 %v1552_v24  ;;  %v1549_v46 = vunpack.i.h.bf16 %v1547_v38  ;;  %v1548_v63 = vunpack.i.l.bf16 %v1547_v38 }
 0x137   : >> { %v447_v60 = vsel %vm441_vm7, %v1549_v46, %v1548_v63  ;;  %v463_v15 = vsel %vm460_vm8, %v1553_v56, %v1554_v4  ;;  %v2520_v58 = vsel %vm441_vm7, %v1548_v63, %v1549_v46  ;;  %v2524_v35 = vsel %vm460_vm8, %v1554_v4, %v1553_v56 }
 0x138   : >> { %v486_v39 = vsel %vm2169_vm5, %v463_v15, %v447_v60  ;;  %v485_v42 = vsel %vm2130_vm2, %v2524_v35, %v2520_v58  ;;  %v476_v19 = vsel %vm2165_vm4, %v447_v60, %v463_v15 }
 0x139   : >> { %v592_v37 = vpack.c.bf16 %v3139_v53, %v486_v39  ;;  %v591_v12 = vpack.c.bf16 %v3140_v48, %v485_v42 }
 0x13a   : >> { %v1557_v11 = vpop.permute.xlu1 %1556 }
 0x13b   : >> { %v1562_v40 = vpop.permute.xlu0 %1561  ;;  %669 = vmatprep.subr.bf16.mxu0 %v592_v37  ;;  %v1559_v36 = vunpack.i.h.bf16 %v1557_v11  ;;  %v1558_v23 = vunpack.i.l.bf16 %v1557_v11 }
 0x13c   : >> { %670 = vmatpush1.bf16.msra.mxu0 %v591_v12  ;;  %v1564_v24 = vunpack.i.h.bf16 %v1562_v40  ;;  %v1563_v38 = vunpack.i.l.bf16 %v1562_v40 }
 0x13e   : >> { %v1572_v4 = vpop.permute.xlu1 %1571  ;;  %v445_v39 = vsel %vm441_vm7, %v1558_v23, %v1563_v38  ;;  %v446_v47 = vsel %vm441_vm7, %v1559_v36, %v1564_v24  ;;  %v443_v17 = vsel %vm441_vm7, %v1564_v24, %v1559_v36  ;;  %v3141_v36 = vpack.c.bf16 %v2335_v55, %v2365_v54 }
 0x13f   : >> { %v1574_v56 = vunpack.i.h.bf16 %v1572_v4  ;;  %v1573_v46 = vunpack.i.l.bf16 %v1572_v4  ;;  %v1567_v63 = vpop.permute.xlu0 %1566  ;;  %v442_v4 = vsel %vm441_vm7, %v1563_v38, %v1558_v23 }
 0x140   : >> { %v1569_v45 = vunpack.i.h.bf16 %v1567_v63  ;;  %v1568_v44 = vunpack.i.l.bf16 %v1567_v63 }
 0x142   : >> { %v1582_v3 = vpop.permute.xlu1 %1581  ;;  %v461_v42 = vsel %vm460_vm8, %v1568_v44, %v1573_v46  ;;  %v462_v53 = vsel %vm460_vm8, %v1569_v45, %v1574_v56  ;;  %v464_v37 = vsel %vm460_vm8, %v1573_v46, %v1568_v44  ;;  %v465_v48 = vsel %vm460_vm8, %v1574_v56, %v1569_v45 }
 0x143   : >> { %v1577_v12 = vpop.permute.xlu0 %1576  ;;  %v482_v11 = vsel %vm2169_vm5, %v461_v42, %v445_v39  ;;  %v484_v40 = vsel %vm2169_vm5, %v462_v53, %v446_v47  ;;  %v481_v46 = vsel %vm2130_vm2, %v464_v37, %v442_v4  ;;  %v483_v56 = vsel %vm2130_vm2, %v465_v48, %v443_v17 }
 0x144   : >> { %v590_v63 = vpack.c.bf16 %v484_v40, %v482_v11  ;;  %v589_v44 = vpack.c.bf16 %v483_v56, %v481_v46  ;;  %v1584_v20 = vunpack.i.h.bf16 %v1582_v3  ;;  %v1583_v21 = vunpack.i.l.bf16 %v1582_v3 }
 0x145   : >> { %v1579_v23 = vunpack.i.h.bf16 %v1577_v12  ;;  %v1578_v38 = vunpack.i.l.bf16 %v1577_v12  ;;  %v586_v40 = vpack.c.bf16 %v2371_v57, %v476_v19  ;;  %v472_v60 = vsel %vm2165_vm4, %v445_v39, %v461_v42 }
 0x146   : >> { %v1597_v45 = vpop.permute.xlu1 %1596  ;;  %671 = vmatprep.subr.bf16.mxu0 %v590_v63  ;;  %v475_v63 = vsel %vm2126_vm1, %v2520_v58, %v2524_v35  ;;  %v474_v15 = vsel %vm2165_vm4, %v446_v47, %v462_v53  ;;  %v567_v3 = vsel %vm460_vm8, %v1583_v21, %v1584_v20  ;;  %v3142_v19 = vpack.c.bf16 %v2343_v59, %v2378_v49 }
 0x147   : >> { %v1587_v18 = vpop.permute.xlu0 %1586  ;;  %672 = vmatpush1.bf16.msra.mxu0 %v589_v44  ;;  %v552_v55 = vsel %vm441_vm7, %v1579_v23, %v1578_v38  ;;  %v549_v54 = vsel %vm441_vm7, %v1578_v38, %v1579_v23  ;;  %v570_v57 = vsel %vm460_vm8, %v1584_v20, %v1583_v21  ;;  %v1599_v42 = vunpack.i.h.bf16 %v1597_v45 }
 0x148   : >> { %673 = vmatprep.subr.bf16.mxu0 %v3141_v36  ;;  %v585_v53 = vpack.c.bf16 %v2383_v61, %v475_v63  ;;  %v584_v12 = vpack.c.bf16 %v474_v15, %v472_v60  ;;  %v471_v46 = vsel %vm2126_vm1, %v442_v4, %v464_v37  ;;  %v1598_v59 = vunpack.i.l.bf16 %v1597_v45 }
 0x149   : >> { %v1589_v49 = vunpack.i.h.bf16 %v1587_v18  ;;  %v1588_v56 = vunpack.i.l.bf16 %v1587_v18  ;;  %v473_v44 = vsel %vm2126_vm1, %v443_v17, %v465_v48  ;;  %v582_v20 = vsel %vm2169_vm5, %v567_v3, %v552_v55 }
 0x14a   : >> { %v1602_v24 = vpop.permute.xlu1 %1601  ;;  %v581_v21 = vsel %vm2130_vm2, %v570_v57, %v549_v54  ;;  %v583_v4 = vpack.c.bf16 %v473_v44, %v471_v46  ;;  %v610_v18 = vpack.c.bf16 %v582_v20, %v582_v20 }
 0x14b   : >> { %v1592_v11 = vpop.permute.xlu0 %1591  ;;  %674 = vmatpush1.bf16.msra.mxu0 %v3142_v19  ;;  %v1604_v58 = vunpack.i.h.bf16 %v1602_v24  ;;  %v1603_v35 = vunpack.i.l.bf16 %v1602_v24  ;;  %v609_v45 = vpack.c.bf16 %v581_v21, %v581_v21  ;;  %v550_v17 = vsel %vm441_vm7, %v1598_v59, %v1588_v56 }
 0x14c   : >> { %v1594_v39 = vunpack.i.h.bf16 %v1592_v11  ;;  %v1593_v47 = vunpack.i.l.bf16 %v1592_v11  ;;  %675 = vmatprep.subr.bf16.mxu0 %v586_v40  ;;  %v551_v48 = vsel %vm441_vm7, %v1599_v42, %v1589_v49  ;;  %v547_v11 = vsel %vm441_vm7, %v1588_v56, %v1598_v59 }
 0x14d   : >> { %v548_v40 = vsel %vm441_vm7, %v1589_v49, %v1599_v42  ;;  %v658_v63 = vsel %vm656_vm10, %v609_v45, 0  ;;  %v575_v42 = vsel %vm2126_vm1, %v549_v54, %v570_v57  ;;  %v767_v54 = vadd.f32 %v1943_v33, %v1947_v34 }
 0x14e   : >> { %v565_v61 = vsel %vm460_vm8, %v1593_v47, %v1603_v35  ;;  %v566_v37 = vsel %vm460_vm8, %v1594_v39, %v1604_v58  ;;  %v568_v36 = vsel %vm460_vm8, %v1603_v35, %v1593_v47  ;;  %v569_v24 = vsel %vm460_vm8, %v1604_v58, %v1594_v39 }
 0x14f   : >> { %676 = vmatpush1.bf16.msra.mxu0 %v585_v53  ;;  %v578_v23 = vsel %vm2169_vm5, %v565_v61, %v550_v17  ;;  %v580_v38 = vsel %vm2169_vm5, %v566_v37, %v551_v48  ;;  %v577_v15 = vsel %vm2130_vm2, %v568_v36, %v547_v11  ;;  %v579_v19 = vsel %vm2130_vm2, %v569_v24, %v548_v40 }
 0x150   : >> { %677 = vmatprep.subr.bf16.mxu0 %v584_v12  ;;  %v608_v60 = vpack.c.bf16 %v580_v38, %v578_v23  ;;  %v607_v58 = vpack.c.bf16 %v579_v19, %v577_v15  ;;  %v576_v35 = vsel %vm2165_vm4, %v552_v55, %v567_v3  ;;  %v3143_v39 = vpack.c.bf16 %v2395_v41, %v2401_v43 }
 0x151   : >> { %v604_v47 = vpack.c.bf16 %v2446_v50, %v576_v35  ;;  %v3144_v53 = vpack.c.bf16 %v2331_v52, %v2349_v0  ;;  %v572_v12 = vsel %vm2165_vm4, %v550_v17, %v565_v61  ;;  %v574_v46 = vsel %vm2165_vm4, %v551_v48, %v566_v37  ;;  %768 = vadd.xlane.f32.xlu0 %v767_v54 }
 0x152   : >> { %v603_v3 = vpack.c.bf16 %v2361_v51, %v575_v42  ;;  %v602_v41 = vpack.c.bf16 %v574_v46, %v572_v12  ;;  %v571_v43 = vsel %vm2126_vm1, %v547_v11, %v568_v36  ;;  %v573_v50 = vsel %vm2126_vm1, %v548_v40, %v569_v24 }
 0x153   : >> { %678 = vmatpush1.bf16.msra.mxu0 %v583_v4  ;;  %v601_v52 = vpack.c.bf16 %v573_v50, %v571_v43  ;;  %v1326_v0 = vcombine.low %v3131_v7, %v3130_v8  ;;  %v1329_v51 = vcombine.high %v2148_v9, %v2153_v10  ;;  %v1328_v55 = vcombine.low %v2148_v9, %v2153_v10 }
 0x154   : >> { %1330 = vmatprep.subr.msk.bf16.mxu0 %vm656_vm10, %v610_v18 }
 0x157   : >> { %684 = vmatpush2.bf16.msra.mxu0 %v658_v63  ;;  %v619_v44 = vpop.permute.xlu1 %618 }
 0x158   : >> { %685 = vmatprep.subr.bf16.mxu0 %v608_v60 }
 0x15b   : >> { %686 = vmatpush2.bf16.msra.mxu0 %v607_v58  ;;  %v624_v11 = vpop.permute.xlu1 %623 }
 0x15c   : >> { %687 = vmatprep.subr.bf16.mxu0 %v3143_v39 }
 0x15f   : >> { %688 = vmatpush2.bf16.msra.mxu0 %v3144_v53 }
 0x160   : >> { %689 = vmatprep.subr.bf16.mxu0 %v604_v47 }
 0x163   : >> { %690 = vmatpush2.bf16.msra.mxu0 %v603_v3 }
 0x164   : >> { %691 = vmatprep.subr.bf16.mxu0 %v602_v41 }
 0x167   : >> { %692 = vmatpush2.bf16.msra.mxu0 %v601_v52 }
 0x168   : >> { %693 = vmatprep.subr.bf16.mxu0 %v2496_v62  ;;  %v614_v62 = vpop.permute.xlu0 %613 }
 0x16b   : >> { %694 = vmatpush2.bf16.msra.mxu0 %v2503_v16 }
 0x16c   : >> { %v629_v23 = vpop.permute.xlu0 %628 }
 0x16e   : >> { %696 = vmatmul.mubr.bf16.vlgmr.msra.gmra.mxu0 %v1326_v0 }
 0x16f   : >> { %1332 = vmatprep.mubr.msk.bf16.mxu0 %vm649_vm9, %v1329_v51 }
 0x176   : >> { %706 = vmatmul.mubr.bf16.gmra.mxu0 %v1328_v55 }
 0x22e   : >> { %v697_v57 = vpop.f32.mrf.mxu0 }
 0x22f   : >> { %v698_v59 = vadd.f32 %v697_v57, %v614_v62 }
 0x230   : >> { %v699_v49 = vpop.f32.mrf.mxu0 }
 0x231   : >> { %v1333_v56 = vmul.f32 -1.442695, %v698_v59  ;;  %v700_v16 = vadd.f32 %v699_v49, %v614_v62 }
 0x232   : >> { %v701_v20 = vpop.f32.mrf.mxu0 }
 0x233   : >> { %1727 = vpow2.f32 %v1333_v56  ;;  %v1334_v21 = vmul.f32 -1.442695, %v700_v16  ;;  %v702_v61 = vadd.f32 %v701_v20, %v619_v44 }
 0x234   : >> { %v703_v37 = vpop.f32.mrf.mxu0 }
 0x235   : >> { %1729 = vpow2.f32 %v1334_v21  ;;  %v1335_v4 = vmul.f32 -1.442695, %v702_v61  ;;  %v704_v18 = vadd.f32 %v703_v37, %v619_v44  ;;  %v774_v61 = vmul.f32 %v1947_v34, %v1947_v34 }
 0x236   : >> { %v707_v45 = vpop.f32.mrf.mxu0  ;;  %v775_v37 = vmul.f32 %v1943_v33, %v1943_v33 }
 0x237   : >> { %1731 = vpow2.f32 %v1335_v4  ;;  %v1336_v17 = vmul.f32 -1.442695, %v704_v18  ;;  %v708_v63 = vadd.f32 %v707_v45, %v624_v11 }
 0x238   : >> { %v709_v48 = vpop.f32.mrf.mxu0 }
 0x239   : >> { %1733 = vpow2.f32 %v1336_v17  ;;  %v710_v42 = vadd.f32 %v709_v48, %v624_v11  ;;  %v779_v48 = vadd.f32 %v775_v37, %v774_v61 }
 0x23a   : >> { %v711_v38 = vpop.f32.mrf.mxu0  ;;  %1735 = vtanh.f32 %v708_v63 }
 0x23b   : >> { %v712_v36 = vadd.f32 %v711_v38, %v629_v23 }
 0x23c   : >> { %v713_v24 = vpop.f32.mrf.mxu0 }
 0x23d   : >> { %v714_v40 = vadd.f32 %v713_v24, %v629_v23  ;;  %v1337_v60 = vmul.f32 -1.442695, %v712_v36  ;;  %v769_v23 = vpop.xlane.xlu0 %768 }
 0x23e   : >> { %v771_v24 = vmul.f32 0.00390625, %v769_v23 }
 0x23f   : >> { %v1338_v19 = vmul.f32 -1.442695, %v714_v40  ;;  %1737 = vpow2.f32 %v1337_v60 }
 0x240   : >> { %v1728_v15 = vpop.eup %1727 }
 0x241   : >> { %v722_v58 = vadd.f32 1.0, %v1728_v15  ;;  %1739 = vpow2.f32 %v1338_v19  ;;  %v785_v19 = vmul.f32 %v771_v24, %v771_v24 }
 0x242   : >> { %v1730_v35 = vpop.eup %1729 }
 0x243   : >> { %v723_v39 = vadd.f32 1.0, %v1730_v35  ;;  %1741 = vrcp.f32 %v722_v58 }
 0x244   : >> { %v1732_v47 = vpop.eup %1731 }
 0x245   : >> { %v734_v53 = vadd.f32 1.0, %v1732_v47  ;;  %1743 = vrcp.f32 %v723_v39 }
 0x246   : >> { %v1734_v12 = vpop.eup %1733 }
 0x247   : >> { %1745 = vrcp.f32 %v734_v53  ;;  %v735_v46 = vadd.f32 1.0, %v1734_v12  ;;  %v1736_v3 = vpop.eup %1735 }
 0x248   : >> { %1747 = vtanh.f32 %v710_v42 }
 0x249   : >> { %1749 = vrcp.f32 %v735_v46 }
 0x24c   : >> { %v1738_v41 = vpop.eup %1737 }
 0x24d   : >> { %v748_v51 = vadd.f32 1.0, %v1738_v41 }
 0x24e   : >> { %v1740_v43 = vpop.eup %1739 }
 0x24f   : >> { %v749_v59 = vadd.f32 1.0, %v1740_v43  ;;  %1751 = vrcp.f32 %v748_v51  ;;  %v1612_v51 = vpack.i.bf16 %v1927_v29, %v1931_v30 }
 0x250   : >> { %v1742_v50 = vpop.eup %1741 }
 0x251   : >> { %v756_v62 = vmul.f32 %v1742_v50, %v1736_v3 }
 0x252   : >> { %v1744_v52 = vpop.eup %1743 }
 0x254   : >> { %v1746_v0 = vpop.eup %1745 }
 0x255   : >> { %v1748_v55 = vpop.eup %1747  ;;  %v754_v54 = vmul.f32 %v1939_v32, %v1746_v0 }
 0x256   : >> { %v1750_v57 = vpop.eup %1749  ;;  %v757_v56 = vmul.f32 %v1748_v55, %v1744_v52 }
 0x257   : >> { %v2658_v32 = vadd.f32 %v756_v62, %v754_v54   ;;  %v755_v49 = vmul.f32 %v1935_v31, %v1750_v57 }
 0x259   : >> { %1753 = vtanh.f32 %v2658_v32  ;;  %v2662_v31 = vadd.f32 %v757_v56, %v755_v49  }
 0x25a   : >> { %1755 = vrcp.f32 %v749_v59 }
 0x25b   : >> { %1757 = vtanh.f32 %v2662_v31 }
 0x25c   : >> { %v1752_v16 = vpop.eup %1751 }
 0x266   : >> { %v1754_v44 = vpop.eup %1753 }
 0x267   : >> { %v1756_v20 = vpop.eup %1755  ;;  %v2665_v36 = vmul.f32 %v1754_v44, %v1752_v16  }
 0x268   : >> { %v1758_v21 = vpop.eup %1757 }
 0x269   : >> { %v2667_v35 = vmul.f32 %v1758_v21, %v1756_v20   ;;  %v772_v18 = vmul.f32 %v2665_v36, %v2665_v36 }
 0x26b   : >> { %v764_v4 = vadd.f32 %v2667_v35, %v2665_v36  ;;  %v773_v45 = vmul.f32 %v2667_v35, %v2667_v35 }
 0x26d   : >> { %765 = vadd.xlane.f32.xlu1 %v764_v4  ;;  %v776_v17 = vadd.f32 %v773_v45, %v772_v18 }
 0x26f   : >> { %777 = vadd.xlane.f32.xlu0 %v776_v17 }
 0x271   : >> { %780 = vadd.xlane.f32.xlu1 %v779_v48 }
 0x2f6   : >> { %v766_v38 = vpop.xlane.xlu1 %765 }
 0x2f7   : >> { %v770_v11 = vmul.f32 0.00390625, %v766_v38 }
 0x2f8   : >> { %v778_v40 = vpop.xlane.xlu0 %777 }
 0x2f9   : >> { %v784_v63 = vmul.f32 %v770_v11, %v770_v11  ;;  %v782_v60 = vmul.f32 0.00390625, %v778_v40 }
 0x2fa   : >> { %v781_v15 = vpop.xlane.xlu1 %780 }
 0x2fb   : >> { %v786_v58 = vsub.f32 %v782_v60, %v784_v63  ;;  %v783_v39 = vmul.f32 0.00390625, %v781_v15 }
 0x2fd   : >> { %v788_v47 = vadd.f32 1e-05, %v786_v58  ;;  %v787_v42 = vsub.f32 %v783_v39, %v785_v19 }
 0x2ff   : >> { %1759 = vrsqrt.f32 %v788_v47  ;;  %v789_v53 = vadd.f32 1e-05, %v787_v42 }
 0x301   : >> { %1761 = vrsqrt.f32 %v789_v53 }
 0x30c   : >> { %v1760_v12 = vpop.eup %1759 }
 0x30d   : >> { %v792_v46 = vmul.f32 %v1760_v12, %v2226_v25 }
 0x30e   : >> { %v1762_v3 = vpop.eup %1761 }
 0x30f   : >> { %796 = vperm.xlu0 %1605, %v792_v46   ;;  %v793_v41 = vmul.f32 %v1762_v3, %v2231_v26  ;;  %v808_v43 = vmul.f32 %v792_v46, %v770_v11 }
 0x311   : >> { %801 = vperm.xlu1 %1606, %v793_v41   ;;  %v809_v50 = vmul.f32 %v793_v41, %v771_v24  ;;  %v810_v52 = vsub.f32 %v2236_v27, %v808_v43 }
 0x313   : >> { %v811_v0 = vsub.f32 %v2241_v28, %v809_v50 }
 0x315   : >> { %814 = vperm.xlu1 %1606, %v810_v52   ;;  %819 = vperm.xlu0 %1605, %v811_v0  }
 0x319   : >> { %1613 = vrot.lane.b32.xlu0 %v1612_v51, %s1965_s12  ;;  %1608 = vrot.lane.b32.xlu1 %v1612_v51, %s1964_s18 }
 0x38a   : >> { %v797_v55 = vpop.permute.xlu0 %796 }
 0x38b   : >> { %v804_v62 = vmul.f32 %v797_v55, %v2665_v36  ;;  %v805_v57 = vmul.f32 %v797_v55, %v2667_v35 }
 0x38c   : >> { %v802_v54 = vpop.permute.xlu1 %801 }
 0x38d   : >> { %v806_v59 = vmul.f32 %v1947_v34, %v802_v54  ;;  %v807_v49 = vmul.f32 %v1943_v33, %v802_v54 }
 0x390   : >> { %v815_v56 = vpop.permute.xlu1 %814  ;;  %v820_v16 = vpop.permute.xlu0 %819 }
 0x391   : >> { %v2691_v44 = vadd.f32 %v815_v56, %v804_v62  ;;  %v2693_v20 = vadd.f32 %v815_v56, %v805_v57  ;;  %v2695_v21 = vadd.f32 %v820_v16, %v806_v59  ;;  %v2697_v61 = vadd.f32 %v820_v16, %v807_v49 }
 0x393   : >> { %v1622_v37 = vpack.i.bf16 %v2697_v61, %v2693_v20  ;;  %v1617_v4 = vpack.i.bf16 %v2695_v21, %v2691_v44  ;;  %v1642_v38 = vpack.i.bf16 %v1927_v29, %v2697_v61  ;;  %v1637_v24 = vpack.i.bf16 %v1931_v30, %v2695_v21 }
 0x394   : >> { %v1609_v18 = vpop.permute.xlu1 %1608  ;;  %v1614_v23 = vpop.permute.xlu0 %1613  ;;  %v1657_v63 = vpack.i.bf16 %v2693_v20, %v2691_v44 }
 0x395   : >> { %1623 = vrot.lane.b32.xlu0 %v1622_v37, %s1964_s18  ;;  %1618 = vrot.lane.b32.xlu1 %v1617_v4, %s1964_s18  ;;  %v1611_v33 = vunpack.i.h.bf16 %v1609_v18  ;;  %v1610_v34 = vunpack.i.l.bf16 %v1609_v18  ;;  %v1616_v11 = vunpack.i.h.bf16 %v1614_v23  ;;  %v1615_v40 = vunpack.i.l.bf16 %v1614_v23  ;;  %s1823_s18 = scalar_lea.vmem (%p355_p11), %s1215_s20, 256 }
 0x396   : > { %p1824_p12 = scmp.ne.s32.totalorder (%p355_p11), %s1215_s20, %s1823_s18 }
 0x397   : >> { %v843_v48 = vsel %vm384_vm6, %v1611_v33, %v1610_v34  ;;  %v861_v60 = vsel %vm329_vm0, %v1616_v11, %v1615_v40  ;;  %v2725_v15 = vsel %vm384_vm6, %v1610_v34, %v1611_v33  ;;  %v2731_v19 = vsel %vm329_vm0, %v1615_v40, %v1616_v11 }
 0x398   : >> { %v2736_v58 = vsel %vm329_vm0, %v2725_v15, %v861_v60  ;;  %v2755_v62 = vsel %vm332_vm3, %v2731_v19, %v843_v48  ;;  %p1825_p4 = pnand (%p355_p11), %p1824_p12, %p3156_p13 }
 0x399   : >> { %1633 = vrot.lane.b32.xlu0 %v1622_v37, %s1965_s12  ;;  %1628 = vrot.lane.b32.xlu1 %v1617_v4, %s1965_s12  ;;  %v1672_v39 = vpack.i.bf16 %v2731_v19, %v2736_v58  ;;  %v1702_v48 = vpack.i.bf16 %v2755_v62, %v2725_v15  ;;  %s1829_s12 = scalar_lea.vmem (%p355_p11), %s1828_s16, 512 }
 0x39a   : > { %p1826_p5 = pneg (%p355_p11), %p1825_p4  ;;  %p1831_p8 = scmp.lt.s32.totalorder (%p355_p11), %s1829_s12, %s1823_s18 }
 0x39c   : > { %p1832_p10 = por (%p355_p11), %p1831_p8, %p1830_p7 }
 0x39d   : >> { %1643 = vrot.lane.b32.xlu0 %v1642_v38, %s1966_s22  ;;  %1638 = vrot.lane.b32.xlu1 %v1637_v24, %s1966_s22 }
 0x39e   : > { %p1833_p0 = pnand (%p355_p11), %p1832_p10, %p1826_p5 }
 0x3a1   : >> { %1658 = vrot.lane.b32.xlu0 %v1657_v63, %s1967_s23  ;;  %1648 = vrot.lane.b32.xlu1 %v1657_v63, %s1966_s22 }
 0x3a5   : >> { %1663 = vrot.lane.b32.xlu0 %v1642_v38, %s1967_s23  ;;  %1653 = vrot.lane.b32.xlu1 %v1637_v24, %s1967_s23 }
 0x3a9   : >> { %1673 = vrot.lane.b32.xlu0 %v1672_v39, %s1967_s23  ;;  %1668 = vrot.lane.b32.xlu1 %v1672_v39, %s1966_s22 }
 0x407   : >> { %v1624_v47 = vpop.permute.xlu0 %1623  ;;  %v1619_v42 = vpop.permute.xlu1 %1618 }
 0x408   : >> { %v1626_v53 = vunpack.i.h.bf16 %v1624_v47  ;;  %v1625_v12 = vunpack.i.l.bf16 %v1624_v47  ;;  %v1621_v46 = vunpack.i.h.bf16 %v1619_v42  ;;  %v1620_v3 = vunpack.i.l.bf16 %v1619_v42 }
 0x40a   : >> { %v2746_v55 = vsel %vm384_vm6, %v1621_v46, %v1626_v53  ;;  %v2750_v54 = vsel %vm384_vm6, %v1620_v3, %v1625_v12  ;;  %v842_v23 = vsel %vm384_vm6, %v1626_v53, %v1621_v46  ;;  %v841_v38 = vsel %vm384_vm6, %v1625_v12, %v1620_v3 }
 0x40b   : >> { %v1634_v41 = vpop.permute.xlu0 %1633  ;;  %v1629_v43 = vpop.permute.xlu1 %1628 }
 0x40c   : >> { %v1636_v50 = vunpack.i.h.bf16 %v1634_v41  ;;  %v1635_v52 = vunpack.i.l.bf16 %v1634_v41  ;;  %v1631_v0 = vunpack.i.h.bf16 %v1629_v43  ;;  %v1630_v51 = vunpack.i.l.bf16 %v1629_v43 }
 0x40d   : >> { %v2804_v41 = vpack.i.bf16 %v2746_v55, %v2750_v54 }
 0x40e   : >> { %v2759_v57 = vsel %vm329_vm0, %v1631_v0, %v1636_v50  ;;  %v860_v59 = vsel %vm329_vm0, %v1636_v50, %v1631_v0  ;;  %v2765_v49 = vsel %vm329_vm0, %v1630_v51, %v1635_v52  ;;  %v859_v56 = vsel %vm329_vm0, %v1635_v52, %v1630_v51 }
 0x40f   : >> { %v2772_v16 = vsel %vm329_vm0, %v2750_v54, %v859_v56  ;;  %v2777_v37 = vsel %vm329_vm0, %v2746_v55, %v860_v59  ;;  %v1644_v4 = vpop.permute.xlu0 %1643  ;;  %v1639_v18 = vpop.permute.xlu1 %1638  ;;  %v1677_v33 = vpack.i.bf16 %v2759_v57, %v2765_v49  ;;  %v2794_v60 = vsel %vm332_vm3, %v2765_v49, %v841_v38 }
 0x410   : >> { %v1682_v34 = vpack.i.bf16 %v2777_v37, %v2772_v16  ;;  %v1645_v24 = vunpack.i.l.bf16 %v1644_v4  ;;  %v1640_v11 = vunpack.i.l.bf16 %v1639_v18  ;;  %v2799_v39 = vsel %vm332_vm3, %v2759_v57, %v842_v23 }
 0x411   : >> { %1678 = vrot.lane.b32.xlu0 %v1677_v33, %s1966_s22  ;;  %v1646_v46 = vunpack.i.h.bf16 %v1644_v4  ;;  %v1641_v3 = vunpack.i.h.bf16 %v1639_v18  ;;  %v1717_v18 = vpack.i.bf16 %v2799_v39, %v2794_v60 }
 0x412   : >> { %1683 = vrot.lane.b32.xlu1 %v1682_v34, %s1966_s22 }
 0x413   : >> { %v1659_v40 = vpop.permute.xlu0 %1658  ;;  %v1649_v63 = vpop.permute.xlu1 %1648 }
 0x414   : >> { %v1661_v47 = vunpack.i.h.bf16 %v1659_v40  ;;  %v1660_v42 = vunpack.i.l.bf16 %v1659_v40  ;;  %v1651_v53 = vunpack.i.h.bf16 %v1649_v63  ;;  %v1650_v12 = vunpack.i.l.bf16 %v1649_v63 }
 0x415   : >> { %1693 = vrot.lane.b32.xlu0 %v1677_v33, %s1967_s23  ;;  %v938_v33 = vsel %vm441_vm7, %v1645_v24, %v1640_v11 }
 0x416   : >> { %v2808_v43 = vsel %vm441_vm7, %v1651_v53, %v1650_v12  ;;  %v952_v50 = vsel %vm460_vm8, %v1660_v42, %v1661_v47  ;;  %v2814_v52 = vsel %vm441_vm7, %v1650_v12, %v1651_v53  ;;  %v2818_v0 = vsel %vm460_vm8, %v1661_v47, %v1660_v42  ;;  %1688 = vrot.lane.b32.xlu1 %v1682_v34, %s1967_s23 }
 0x417   : >> { %v1664_v51 = vpop.permute.xlu0 %1663  ;;  %v1654_v59 = vpop.permute.xlu1 %1653  ;;  %v965_v56 = vsel %vm2169_vm5, %v952_v50, %v2808_v43  ;;  %v964_v4 = vsel %vm2130_vm2, %v2818_v0, %v2814_v52  ;;  %v939_v42 = vsel %vm441_vm7, %v1646_v46, %v1641_v3 }
 0x418   : >> { %v1666_v23 = vunpack.i.h.bf16 %v1664_v51  ;;  %v1665_v38 = vunpack.i.l.bf16 %v1664_v51  ;;  %v1656_v34 = vunpack.i.h.bf16 %v1654_v59  ;;  %v1655_v40 = vunpack.i.l.bf16 %v1654_v59 }
 0x419   : >> { %1703 = vrot.lane.b32.xlu0 %v1702_v48, %s1967_s23  ;;  %v1033_v63 = vpack.c.bf16 %v965_v56, %v1927_v29  ;;  %v1032_v47 = vpack.c.bf16 %v964_v4, %v1931_v30  ;;  %v935_v51 = vsel %vm441_vm7, %v1640_v11, %v1645_v24 }
 0x41a   : >> { %v953_v53 = vsel %vm460_vm8, %v1655_v40, %v1665_v38  ;;  %v954_v12 = vsel %vm460_vm8, %v1656_v34, %v1666_v23  ;;  %v956_v59 = vsel %vm460_vm8, %v1665_v38, %v1655_v40  ;;  %1698 = vrot.lane.b32.xlu1 %v1702_v48, %s1966_s22  ;;  %v957_v2 = vsel %vm460_vm8, %v1666_v23, %v1656_v34 }
 0x41b   : >> { %1096 = vmatprep.subr.bf16.mxu1 %v1033_v63  ;;  %v1674_v56 = vpop.permute.xlu0 %1673  ;;  %v1669_v4 = vpop.permute.xlu1 %1668  ;;  %v961_v17 = vsel %vm2165_vm4, %v938_v33, %v953_v53  ;;  %v963_v45 = vsel %vm2165_vm4, %v939_v42, %v954_v12  ;;  %v3145_v38 = vpack.c.bf16 %v2697_v61, %v2693_v20  ;;  %v936_v48 = vsel %vm441_vm7, %v1641_v3, %v1646_v46 }
 0x41c   : >> { %1097 = vmatpush1.bf16.msra.mxu1 %v1032_v47  ;;  %v1676_v7 = vunpack.i.h.bf16 %v1674_v56  ;;  %v1675_v24 = vunpack.i.l.bf16 %v1674_v56  ;;  %v1671_v11 = vunpack.i.h.bf16 %v1669_v4  ;;  %v1670_v8 = vunpack.i.l.bf16 %v1669_v4  ;;  %v3151_v4 = vld [vmem:[#allocation11_spill] sm:$0xff] }
 0x41d   : >> { %1098 = vmatprep.subr.bf16.mxu1 %v3145_v38  ;;  %1718 = vrot.lane.b32.xlu0 %v1717_v18, %s1966_s22  ;;  %v960_v40 = vsel %vm2126_vm1, %v935_v51, %v956_v59  ;;  %v967_v23 = vsel %vm2169_vm5, %v953_v53, %v938_v33  ;;  %v1029_v34 = vpack.c.bf16 %v963_v45, %v961_v17 }
 0x41e   : >> { %v891_v63 = vsel %vm441_vm7, %v1671_v11, %v1670_v8  ;;  %v906_v47 = vsel %vm460_vm8, %v1675_v24, %v1676_v7  ;;  %v888_v20 = vsel %vm441_vm7, %v1670_v8, %v1671_v11  ;;  %1708 = vrot.lane.b32.xlu1 %v2804_v41, %s1966_s22  ;;  %v962_v61 = vsel %vm2126_vm1, %v936_v48, %v957_v2 }
 0x41f   : >> { %v909_v46 = vsel %vm460_vm8, %v1676_v7, %v1675_v24  ;;  %v915_v45 = vsel %vm2165_vm4, %v891_v63, %v906_v47  ;;  %v969_v17 = vsel %vm2169_vm5, %v954_v12, %v939_v42  ;;  %v3146_v3 = vpack.c.bf16 %v2695_v21, %v2691_v44 }
 0x420   : >> { %v921_v8 = vsel %vm2169_vm5, %v906_v47, %v891_v63  ;;  %v2884_v33 = vpack.c.bf16 %v2765_v49, %v915_v45  ;;  %v914_v53 = vsel %vm2126_vm1, %v888_v20, %v909_v46  ;;  %v2892_v42 = vpack.c.bf16 %v969_v17, %v967_v23 }
 0x421   : >> { %1099 = vmatpush1.bf16.msra.mxu1 %v3146_v3  ;;  %1723 = vrot.lane.b32.xlu0 %v1717_v18, %s1967_s23  ;;  %v2890_v7 = vpack.c.bf16 %v2772_v16, %v914_v53  ;;  %v959_v44 = vsel %vm2165_vm4, %v2808_v43, %v952_v50  ;;  %v1028_v21 = vpack.c.bf16 %v962_v61, %v960_v40 }
 0x422   : >> { %1100 = vmatprep.subr.bf16.mxu1 %v1029_v34  ;;  %v966_v49 = vsel %vm2130_vm2, %v956_v59, %v935_v51  ;;  %v968_v12 = vsel %vm2130_vm2, %v957_v2, %v936_v48  ;;  %1713 = vrot.lane.b32.xlu1 %v2804_v41, %s1967_s23  ;;  %v1027_v18 = vpack.c.bf16 %v959_v44, %v921_v8  ;;  %v3147_v2 = vld [vmem:[#allocation19_spill] sm:$0xff]  ;;  %v3148_v41 = vld [vmem:[#allocation21_spill] sm:$0xff]  ;;  %v3149_v51 = vld [vmem:[#allocation20_spill] sm:$0xff] }
 0x423   : >> { %v920_v16 = vsel %vm2130_vm2, %v909_v46, %v888_v20  ;;  %v2905_v56 = vpack.c.bf16 %v968_v12, %v966_v49  ;;  %v958_v43 = vsel %vm2126_vm1, %v2814_v52, %v2818_v0  ;;  %v3150_v59 = vld [vmem:[#allocation12_spill] sm:$0xff] }
 0x424   : >> { %v1026_v50 = vpack.c.bf16 %v958_v43, %v920_v16  ;;  %v1340_v24 = vcombine.high %v3151_v4, %v3150_v59 }
 0x425   : >> { %1101 = vmatpush1.bf16.msra.mxu1 %v1028_v21  ;;  %1053 = vperm.xlu0 %1605, %v2211_v22  }
 0x426   : >> { %1102 = vmatprep.subr.bf16.mxu1 %v1027_v18  ;;  %1048 = vperm.xlu1 %1606, %v3147_v2  }
 0x427   : >> { %1344 = vmatprep.mubr.msk.bf16.mxu1 %vm649_vm9, %v1340_v24 }
 0x429   : >> { %1103 = vmatpush1.bf16.msra.mxu1 %v1026_v50  ;;  %1063 = vperm.xlu0 %1605, %v3148_v41  }
 0x42a   : >> { %1058 = vperm.xlu1 %1606, %v3149_v51  }
 0x483   : >> { %v1679_v11 = vpop.permute.xlu0 %1678 }
 0x484   : >> { %v1684_v38 = vpop.permute.xlu1 %1683  ;;  %v1681_v48 = vunpack.i.h.bf16 %v1679_v11  ;;  %v1680_v52 = vunpack.i.l.bf16 %v1679_v11  ;;  %v1023_v11 = vpack.c.bf16 %v2731_v19, %v2759_v57 }
 0x485   : >> { %v1686_v40 = vunpack.i.h.bf16 %v1684_v38  ;;  %v1685_v23 = vunpack.i.l.bf16 %v1684_v38 }
 0x487   : >> { %v1694_v0 = vpop.permute.xlu0 %1693  ;;  %v889_v45 = vsel %vm441_vm7, %v1680_v52, %v1685_v23  ;;  %v890_v17 = vsel %vm441_vm7, %v1681_v48, %v1686_v40  ;;  %v886_v16 = vsel %vm441_vm7, %v1685_v23, %v1680_v52  ;;  %v887_v43 = vsel %vm441_vm7, %v1686_v40, %v1681_v48 }
 0x488   : >> { %v1696_v34 = vunpack.i.h.bf16 %v1694_v0  ;;  %v1695_v63 = vunpack.i.l.bf16 %v1694_v0  ;;  %v1689_v47 = vpop.permute.xlu1 %1688  ;;  %v1022_v40 = vpack.c.bf16 %v2736_v58, %v2777_v37 }
 0x489   : >> { %v1691_v20 = vunpack.i.h.bf16 %v1689_v47  ;;  %v1690_v61 = vunpack.i.l.bf16 %v1689_v47 }
 0x48b   : >> { %v1704_v46 = vpop.permute.xlu0 %1703  ;;  %v904_v3 = vsel %vm460_vm8, %v1690_v61, %v1695_v63  ;;  %v905_v8 = vsel %vm460_vm8, %v1691_v20, %v1696_v34  ;;  %v907_v49 = vsel %vm460_vm8, %v1695_v63, %v1690_v61  ;;  %v908_v12 = vsel %vm460_vm8, %v1696_v34, %v1691_v20 }
 0x48c   : >> { %v1699_v53 = vpop.permute.xlu1 %1698  ;;  %v917_v44 = vsel %vm2169_vm5, %v904_v3, %v889_v45  ;;  %v919_v21 = vsel %vm2169_vm5, %v905_v8, %v890_v17  ;;  %v916_v2 = vsel %vm2130_vm2, %v907_v49, %v886_v16  ;;  %v918_v41 = vsel %vm2130_vm2, %v908_v12, %v887_v43 }
 0x48d   : >> { %v1025_v18 = vpack.c.bf16 %v919_v21, %v917_v44  ;;  %v1024_v51 = vpack.c.bf16 %v918_v41, %v916_v2  ;;  %v1706_v38 = vunpack.i.h.bf16 %v1704_v46  ;;  %v1705_v0 = vunpack.i.l.bf16 %v1704_v46 }
 0x48e   : >> { %v1701_v34 = vunpack.i.h.bf16 %v1699_v53  ;;  %v1700_v52 = vunpack.i.l.bf16 %v1699_v53  ;;  %v911_v63 = vsel %vm2165_vm4, %v889_v45, %v904_v3  ;;  %v913_v47 = vsel %vm2165_vm4, %v890_v17, %v905_v8 }
 0x48f   : >> { %v1719_v50 = vpop.permute.xlu0 %1718  ;;  %1104 = vmatprep.subr.bf16.mxu1 %v1025_v18  ;;  %v1002_v19 = vsel %vm460_vm8, %v1705_v0, %v1706_v38  ;;  %v1005_v58 = vsel %vm460_vm8, %v1706_v38, %v1705_v0  ;;  %v1019_v8 = vpack.c.bf16 %v913_v47, %v911_v63  ;;  %v910_v21 = vsel %vm2126_vm1, %v886_v16, %v907_v49 }
 0x490   : >> { %v1709_v24 = vpop.permute.xlu1 %1708  ;;  %1105 = vmatpush1.bf16.msra.mxu1 %v1024_v51  ;;  %v987_v57 = vsel %vm441_vm7, %v1701_v34, %v1700_v52  ;;  %v984_v20 = vsel %vm441_vm7, %v1700_v52, %v1701_v34  ;;  %v1721_v17 = vunpack.i.h.bf16 %v1719_v50  ;;  %v1720_v3 = vunpack.i.l.bf16 %v1719_v50 }
 0x491   : >> { %1106 = vmatprep.subr.bf16.mxu1 %v1023_v11  ;;  %v1711_v53 = vunpack.i.h.bf16 %v1709_v24  ;;  %v1710_v44 = vunpack.i.l.bf16 %v1709_v24  ;;  %v912_v18 = vsel %vm2126_vm1, %v887_v43, %v908_v12  ;;  %v1017_v2 = vsel %vm2169_vm5, %v1002_v19, %v987_v57 }
 0x492   : >> { %v1016_v41 = vsel %vm2130_vm2, %v1005_v58, %v984_v20  ;;  %v1018_v51 = vpack.c.bf16 %v912_v18, %v910_v21  ;;  %v1045_v49 = vpack.c.bf16 %v1017_v2, %v1017_v2  ;;  %v1041_v47 = vpack.c.bf16 %v2755_v62, %v2799_v39 }
 0x493   : >> { %v1724_v48 = vpop.permute.xlu0 %1723  ;;  %v1044_v16 = vpack.c.bf16 %v1016_v41, %v1016_v41  ;;  %v985_v12 = vsel %vm441_vm7, %v1720_v3, %v1710_v44  ;;  %v986_v43 = vsel %vm441_vm7, %v1721_v17, %v1711_v53  ;;  %v982_v0 = vsel %vm441_vm7, %v1710_v44, %v1720_v3 }
 0x494   : >> { %v1714_v23 = vpop.permute.xlu1 %1713  ;;  %1107 = vmatpush1.bf16.msra.mxu1 %v1022_v40  ;;  %v1726_v37 = vunpack.i.h.bf16 %v1724_v48  ;;  %v1725_v61 = vunpack.i.l.bf16 %v1724_v48  ;;  %v983_v34 = vsel %vm441_vm7, %v1711_v53, %v1721_v17 }
 0x495   : >> { %v1716_v46 = vunpack.i.h.bf16 %v1714_v23  ;;  %v1715_v45 = vunpack.i.l.bf16 %v1714_v23  ;;  %1108 = vmatprep.subr.bf16.mxu1 %v2884_v33  ;;  %v1091_v52 = vsel %vm656_vm10, %v1044_v16, 0 }
 0x497   : >> { %v1000_v33 = vsel %vm460_vm8, %v1715_v45, %v1725_v61  ;;  %v1001_v50 = vsel %vm460_vm8, %v1716_v46, %v1726_v37  ;;  %v1003_v11 = vsel %vm460_vm8, %v1725_v61, %v1715_v45  ;;  %v1004_v38 = vsel %vm460_vm8, %v1726_v37, %v1716_v46 }
 0x498   : >> { %1109 = vmatpush1.bf16.msra.mxu1 %v2890_v7  ;;  %v1013_v7 = vsel %vm2169_vm5, %v1000_v33, %v985_v12  ;;  %v1015_v24 = vsel %vm2169_vm5, %v1001_v50, %v986_v43  ;;  %v1012_v40 = vsel %vm2130_vm2, %v1003_v11, %v982_v0  ;;  %v1014_v23 = vsel %vm2130_vm2, %v1004_v38, %v983_v34 }
 0x499   : >> { %1110 = vmatprep.subr.bf16.mxu1 %v1019_v8  ;;  %v1043_v48 = vpack.c.bf16 %v1015_v24, %v1013_v7  ;;  %v1042_v63 = vpack.c.bf16 %v1014_v23, %v1012_v40  ;;  %v1011_v37 = vsel %vm2165_vm4, %v987_v57, %v1002_v19  ;;  %v1040_v61 = vpack.c.bf16 %v2725_v15, %v2746_v55 }
 0x49a   : >> { %v1039_v46 = vpack.c.bf16 %v2794_v60, %v1011_v37  ;;  %v1010_v45 = vsel %vm2126_vm1, %v984_v20, %v1005_v58  ;;  %v1007_v17 = vsel %vm2165_vm4, %v985_v12, %v1000_v33  ;;  %v1009_v62 = vsel %vm2165_vm4, %v986_v43, %v1001_v50  ;;  %v3152_v20 = vld [vmem:[#allocation14_spill] sm:$0xff] }
 0x49b   : >> { %v1038_v39 = vpack.c.bf16 %v2750_v54, %v1010_v45  ;;  %v1037_v19 = vpack.c.bf16 %v1009_v62, %v1007_v17  ;;  %v1006_v57 = vsel %vm2126_vm1, %v982_v0, %v1003_v11  ;;  %v1008_v15 = vsel %vm2126_vm1, %v983_v34, %v1004_v38  ;;  %v3153_v54 = vld [vmem:[#allocation13_spill] sm:$0xff] }
 0x49c   : >> { %1111 = vmatpush1.bf16.msra.mxu1 %v1018_v51  ;;  %v1036_v55 = vpack.c.bf16 %v1008_v15, %v1006_v57  ;;  %v1339_v60 = vcombine.low %v3151_v4, %v3150_v59  ;;  %v1342_v58 = vcombine.high %v3153_v54, %v3152_v20  ;;  %v1341_v3 = vcombine.low %v3153_v54, %v3152_v20 }
 0x49d   : >> { %1343 = vmatprep.subr.msk.bf16.mxu1 %vm656_vm10, %v1045_v49 }
 0x4a0   : >> { %1117 = vmatpush2.bf16.msra.mxu1 %v1091_v52  ;;  %v1054_v2 = vpop.permute.xlu0 %1053 }
 0x4a1   : >> { %1118 = vmatprep.subr.bf16.mxu1 %v1043_v48  ;;  %v1049_v8 = vpop.permute.xlu1 %1048 }
 0x4a4   : >> { %1119 = vmatpush2.bf16.msra.mxu1 %v1042_v63  ;;  %v1064_v7 = vpop.permute.xlu0 %1063 }
 0x4a5   : >> { %1120 = vmatprep.subr.bf16.mxu1 %v1041_v47  ;;  %v1059_v0 = vpop.permute.xlu1 %1058 }
 0x4a8   : >> { %1121 = vmatpush2.bf16.msra.mxu1 %v1040_v61 }
 0x4a9   : >> { %1122 = vmatprep.subr.bf16.mxu1 %v1039_v46 }
 0x4ac   : >> { %1123 = vmatpush2.bf16.msra.mxu1 %v1038_v39 }
 0x4ad   : >> { %1124 = vmatprep.subr.bf16.mxu1 %v1037_v19 }
 0x4b0   : >> { %1125 = vmatpush2.bf16.msra.mxu1 %v1036_v55 }
 0x4b1   : >> { %1126 = vmatprep.subr.bf16.mxu1 %v2892_v42 }
 0x4b4   : >> { %1127 = vmatpush2.bf16.msra.mxu1 %v2905_v56 }
 0x4b7   : >> { %1129 = vmatmul.mubr.bf16.vlgmr.msra.gmra.mxu1 %v1339_v60 }
 0x4b8   : >> { %1345 = vmatprep.mubr.msk.bf16.mxu1 %vm649_vm9, %v1342_v58 }
 0x4bf   : >> { %1139 = vmatmul.mubr.bf16.gmra.mxu1 %v1341_v3 }
 0x577   : >> { %v1130_v53 = vpop.f32.mrf.mxu1 }
 0x578   : >> { %v1131_v44 = vadd.f32 %v1130_v53, %v1049_v8 }
 0x579   : >> { %v1132_v21 = vpop.f32.mrf.mxu1 }
 0x57a   : >> { %v1346_v42 = vmul.f32 -1.442695, %v1131_v44  ;;  %v1133_v18 = vadd.f32 %v1132_v21, %v1049_v8 }
 0x57b   : >> { %v1134_v41 = vpop.f32.mrf.mxu1 }
 0x57c   : >> { %1763 = vpow2.f32 %v1346_v42  ;;  %v1347_v56 = vmul.f32 -1.442695, %v1133_v18  ;;  %v1135_v33 = vadd.f32 %v1134_v41, %v1054_v2 }
 0x57d   : >> { %v1136_v50 = vpop.f32.mrf.mxu1 }
 0x57e   : >> { %1765 = vpow2.f32 %v1347_v56  ;;  %v1348_v51 = vmul.f32 -1.442695, %v1135_v33  ;;  %v1137_v49 = vadd.f32 %v1136_v50, %v1054_v2 }
 0x57f   : >> { %v1140_v16 = vpop.f32.mrf.mxu1 }
 0x580   : >> { %1767 = vpow2.f32 %v1348_v51  ;;  %v1349_v12 = vmul.f32 -1.442695, %v1137_v49  ;;  %v1141_v52 = vadd.f32 %v1140_v16, %v1059_v0 }
 0x581   : >> { %v1142_v43 = vpop.f32.mrf.mxu1 }
 0x582   : >> { %1769 = vpow2.f32 %v1349_v12  ;;  %v1143_v46 = vadd.f32 %v1142_v43, %v1059_v0 }
 0x583   : >> { %v1144_v24 = vpop.f32.mrf.mxu1  ;;  %1771 = vtanh.f32 %v1141_v52 }
 0x584   : >> { %v1145_v11 = vadd.f32 %v1144_v24, %v1064_v7 }
 0x585   : >> { %v1146_v38 = vpop.f32.mrf.mxu1 }
 0x586   : >> { %v1147_v34 = vadd.f32 %v1146_v38, %v1064_v7  ;;  %v1350_v48 = vmul.f32 -1.442695, %v1145_v11 }
 0x588   : >> { %v1351_v23 = vmul.f32 -1.442695, %v1147_v34  ;;  %1773 = vpow2.f32 %v1350_v48 }
 0x589   : >> { %v1764_v40 = vpop.eup %1763 }
 0x58a   : >> { %v1155_v63 = vadd.f32 1.0, %v1764_v40  ;;  %1775 = vpow2.f32 %v1351_v23 }
 0x58b   : >> { %v1766_v47 = vpop.eup %1765 }
 0x58c   : >> { %v1156_v37 = vadd.f32 1.0, %v1766_v47  ;;  %1777 = vrcp.f32 %v1155_v63 }
 0x58d   : >> { %v1768_v61 = vpop.eup %1767 }
 0x58e   : >> { %v1167_v45 = vadd.f32 1.0, %v1768_v61  ;;  %1779 = vrcp.f32 %v1156_v37 }
 0x58f   : >> { %v1770_v17 = vpop.eup %1769 }
 0x590   : >> { %1781 = vrcp.f32 %v1167_v45  ;;  %v1168_v62 = vadd.f32 1.0, %v1770_v17  ;;  %v1772_v39 = vpop.eup %1771 }
 0x591   : >> { %1783 = vtanh.f32 %v1143_v46 }
 0x592   : >> { %1785 = vrcp.f32 %v1168_v62 }
 0x595   : >> { %v1774_v19 = vpop.eup %1773 }
 0x596   : >> { %v1181_v58 = vadd.f32 1.0, %v1774_v19 }
 0x597   : >> { %v1776_v57 = vpop.eup %1775 }
 0x598   : >> { %v1182_v21 = vadd.f32 1.0, %v1776_v57  ;;  %1787 = vrcp.f32 %v1181_v58 }
 0x599   : >> { %v1778_v15 = vpop.eup %1777 }
 0x59a   : >> { %v1189_v53 = vmul.f32 %v1778_v15, %v1772_v39 }
 0x59b   : >> { %v1780_v55 = vpop.eup %1779 }
 0x59d   : >> { %v1782_v60 = vpop.eup %1781 }
 0x59e   : >> { %v1784_v3 = vpop.eup %1783  ;;  %v1187_v8 = vmul.f32 %v1931_v30, %v1782_v60 }
 0x59f   : >> { %v1786_v44 = vpop.eup %1785  ;;  %v1190_v18 = vmul.f32 %v1784_v3, %v1780_v55 }
 0x5a0   : >> { %v1191_v30 = vadd.f32 %v1189_v53, %v1187_v8   ;;  %v1188_v42 = vmul.f32 %v1927_v29, %v1786_v44 }
 0x5a2   : >> { %1789 = vtanh.f32 %v1191_v30  ;;  %v1192_v29 = vadd.f32 %v1190_v18, %v1188_v42  }
 0x5a3   : >> { %1791 = vrcp.f32 %v1182_v21 }
 0x5a4   : >> { %1793 = vtanh.f32 %v1192_v29 }
 0x5a5   : >> { %v1788_v2 = vpop.eup %1787 }
 0x5af   : >> { %v1790_v41 = vpop.eup %1789 }
 0x5b0   : >> { %v1792_v56 = vpop.eup %1791  ;;  %v1195_v50 = vmul.f32 %v1790_v41, %v1788_v2   ;;  %357 = sbr.rel (!%p355_p11) target bundleno = 67 (0x43), region = 101 }
 0x5b1   : >> { %v1794_v33 = vpop.eup %1793 }
 0x5b2   : >> { %v1196_v51 = vmul.f32 %v1794_v33, %v1792_v56   ;;  %v3155_v34 = vmov %v1195_v50  ;;  %1197 = vst [vmem:[%s2245_s8] sm:$0xff] (%p355_p11), %v1195_v50 }
 0x5b4   : >> { %v3154_v33 = vmov %v1196_v51  ;;  %1198 = vst [vmem:[%s2245_s8 + $0x8] sm:$0xff] (%p355_p11), %v1196_v51 }
 0x5b5   : > { %1836 = shalt.err (!%p1833_p0)
}
 0x5b6   : > { %s1837_s28 = scalar_lea.hbm %s1212_s9, 256  ;;  %s1841_s22 = scalar_lea.hbm %s3091_s7, 512 }
 0x5b7   : > { %p1838_p2 = scmp.ne.s32.totalorder %s1212_s9, %s1837_s28  ;;  %p1842_p3 = scmp.lt.s32.totalorder %s1212_s9, %s3091_s7 }
 0x5b8   : > { %p1843_p6 = scmp.lt.s32.totalorder %s1841_s22, %s1837_s28 }
 0x5b9   : > { %p1839_p9 = pnand %p1838_p2, %p3156_p13 }
 0x5ba   : > { %p1844_p11 = por %p1843_p6, %p1842_p3 }
 0x5bb   : > { %p1840_p1 = pneg %p1839_p9 }
 0x5bd   : > { %p1845_p12 = pnand %p1844_p11, %p1840_p1 }
 0x5bf   : > { %1848 = shalt.err (!%p1845_p12)
}
 0x5c0   : > { %1362 = dma.vmem_to_hbm [thread:$0]  (%p3156_p13), %s1215_s20, 256, %s1212_s9, %s1200_s11  }
 0x5c1 PF: > { %s1226_s19 = sand.u32 1, %s1911_s24   ;;  %p3157_p4 = scmp.ne.s32.totalorder %s3105_s14, 0 }
 0x5c2   : > { %p3158_p5 = scmp.ge.s32.totalorder %s1923_s27, 2  ;;  %s1227_s21 = scalar_lea.sflag [#allocation4], %s1226_s19 }
 0x5c4   : > { %p1369_p7 = pnand %p3158_p5, %p3157_p4 }
 0x5c6   : > { %p1370_p8 = pneg %p1369_p7 }
 0x5c8   : > { %1906 = dma.done.wait (%p1370_p8), %s1227_s21, 256  }
 0x5c9   : > { %1908 = vsyncadd (%p1370_p8), %s1227_s21, 4294967040  ;;  %p20_p10 = scmp.ge.s32.totalorder %s2035_s30, 4   ;;  %s3159_s24 = smov %s1915_s25 }
 0x5ca   : > { %s3160_s25 = smov %s1919_s26  ;;  %s3161_s26 = smov %s2047_s10 }
 0x5cb   : > { %s3162_s27 = smov %s2035_s30  ;;  %22 = sbr.rel (!%p20_p10) target bundleno = 5 (0x5), region = 112 }
 0x5d0   :  { %1232 = vsyncpa [#allocation3], 1 }
 0x5d1   :  { %1234 = vsyncpa [#allocation3 + $0x1], 1 }
 0x5d2   :  { %1235 = vsyncpa [#allocation4], 1 }
 0x5d3   :  { %1237 = vsyncpa [#allocation4 + $0x1], 1 }

</bundles_post_ra>
